<compile_context>
chip_gen: v6e
topology: v6e:2x2x1
jax: 0.10.0
libtpu: 0.0.40
codegen_flags: <defaults>
</compile_context>

<pallas_src>
import math
import functools

import jax
import jax.numpy as jnp
from jax import lax
from jax.experimental import pallas as pl
from jax.experimental.pallas import tpu as pltpu


def _attention_kernel(x_ref, wqkv_ref, wout_ref, bout_ref, out_ref,
                      *, heads, dim_head, seq_len, scale):
    """Fused multi-head self-attention for a block of `bb` batch samples.

    x_ref    : (bb*N, D)        input activations (D on the lane axis)
    wqkv_ref : (D, 3*H*dh)      packed QKV projection weight (no bias)
    wout_ref : (H*dh, Dout)     output projection weight
    bout_ref : (1, Dout)        output projection bias
    out_ref  : (bb*N, Dout)
    """
    n = seq_len
    bb = x_ref.shape[0] // n
    inner = heads * dim_head

    # ---- QKV projection: one big lane-dense bf16 MXU matmul over the whole block.
    wqkv_bf = wqkv_ref[...].astype(jnp.bfloat16)
    qkv = jnp.dot(x_ref[...].astype(jnp.bfloat16), wqkv_bf,
                  preferred_element_type=jnp.float32)            # (bb*N, 3*inner) f32

    wout_bf = wout_ref[...].astype(jnp.bfloat16)
    bias = bout_ref[...]                                         # (1, Dout) f32

    for bi in range(bb):                                         # tiny, unrolled
        qkv_b = qkv[bi * n:(bi + 1) * n, :]                      # (N, 3*inner)

        head_outs = []
        for h in range(heads):                                   # small, unrolled
            off = h * dim_head
            # fold the score scale into q (O(N*dh), not O(N^2))
            q = (qkv_b[:, off:off + dim_head] * scale).astype(jnp.bfloat16)
            k = qkv_b[:, inner + off:inner + off + dim_head].astype(jnp.bfloat16)
            v = qkv_b[:, 2 * inner + off:2 * inner + off + dim_head].astype(jnp.bfloat16)

            # scores: rhs-transposed dot_general (no transpose op), f32 accumulate.
            s = lax.dot_general(q, k, (((1,), (1,)), ((), ())),
                                preferred_element_type=jnp.float32)   # (N, N) f32

            # numerically-stable softmax numerator in f32 (VPU/EUP work stays f32).
            m = jnp.max(s, axis=-1, keepdims=True)
            p = jnp.exp(s - m)                                   # (N, N) f32, EUP
            l = jnp.sum(p, axis=-1, keepdims=True)               # (N, 1)  f32

            # PV matmul first, normalize after (O(N*dh)); reciprocal on the EUP.
            o = jnp.dot(p.astype(jnp.bfloat16), v,
                        preferred_element_type=jnp.float32)      # (N, dh) f32
            head_outs.append(o * pl.reciprocal(l, approx=True))

        # 'b h n d -> b n (h d)': concat heads on the lane axis -> (N, inner=128),
        # then ONE full-depth K=128 output projection instead of H K=32 matmuls.
        o_all = jnp.concatenate(head_outs, axis=-1)              # (N, inner)
        out_b = jnp.dot(o_all.astype(jnp.bfloat16), wout_bf,
                        preferred_element_type=jnp.float32) + bias    # (N, Dout)

        # lane-dense store of this sample's output rows
        out_ref[bi * n:(bi + 1) * n, :] = out_b.astype(out_ref.dtype)


def attention_forward(x, wqkv, wout, bout, *, heads, dim_head, batch_block=None):
    """x: (B, N, dim) f32 -> (B, N, dim*factor) f32 (PyTorch Attention.forward,
    eval mode, project_out=True).

    batch_block=None fuses the whole batch into a single grid step (best on
    single-TC v5e/v6e).  On v7x set batch_block=B//2 so the "parallel" grid
    axis shards the two halves across the 2 TensorCores.
    """
    b, n, d = x.shape
    inner = heads * dim_head
    dout = wout.shape[-1]
    scale = dim_head ** (-0.5)

    bb = b if batch_block is None else batch_block
    assert b % bb == 0, "batch_block must divide batch"

    x2d = x.reshape(b * n, d)            # free view: batch fused onto the row axis
    bout_2d = bout.reshape(1, dout)

    kernel = functools.partial(_attention_kernel, heads=heads, dim_head=dim_head,
                               seq_len=n, scale=scale)

    grid_spec = pltpu.PrefetchScalarGridSpec(
        num_scalar_prefetch=0,
        grid=(b // bb,),                                   # default: single step
        in_specs=[
            pl.BlockSpec((bb * n, d), lambda i: (i, 0)),
            pl.BlockSpec((d, 3 * inner), lambda i: (0, 0)),
            pl.BlockSpec((inner, dout), lambda i: (0, 0)),
            pl.BlockSpec((1, dout), lambda i: (0, 0)),
        ],
        out_specs=pl.BlockSpec((bb * n, dout), lambda i: (i, 0)),
    )

    out2d = pl.pallas_call(
        kernel,
        out_shape=jax.ShapeDtypeStruct((b * n, dout), x.dtype),
        grid_spec=grid_spec,
        compiler_params=pltpu.CompilerParams(
            dimension_semantics=("parallel",)),            # shard batch blocks (v7x)
    )(x2d, wqkv, wout, bout_2d)

    return out2d.reshape(b, n, dout)


def attention_reference_f32(x, wqkv, wout, bout, *, heads, dim_head):
    """Pure-JAX f32 reference mirroring the PyTorch module (eval mode)."""
    b, n, _ = x.shape
    inner = heads * dim_head
    qkv = x @ wqkv
    q, k, v = jnp.split(qkv, 3, axis=-1)

    def split_heads(t):                              # 'b n (h d) -> b h n d'
        return t.reshape(b, n, heads, dim_head).transpose(0, 2, 1, 3)

    q, k, v = map(split_heads, (q, k, v))
    dots = jnp.einsum('bhnd,bhmd->bhnm', q, k) * (dim_head ** -0.5)
    attn = jax.nn.softmax(dots, axis=-1)
    out = jnp.einsum('bhnm,bhmd->bhnd', attn, v)
    out = out.transpose(0, 2, 1, 3).reshape(b, n, inner)   # 'b h n d -> b n (h d)'
    return out @ wout + bout


def attention_reference_bf16(x, wqkv, wout, bout, *, heads, dim_head):
    """Reference using the same bf16-operand / f32-accumulate numerics as the kernel."""
    b, n, _ = x.shape
    inner = heads * dim_head
    scale = dim_head ** (-0.5)
    bf, f32 = jnp.bfloat16, jnp.float32

    qkv = jnp.dot(x.astype(bf).reshape(b * n, -1), wqkv.astype(bf),
                  preferred_element_type=f32).reshape(b, n, 3 * inner)
    q, k, v = jnp.split(qkv, 3, axis=-1)

    def split_heads(t):
        return t.reshape(b, n, heads, dim_head).transpose(0, 2, 1, 3)

    q, k, v = map(split_heads, (q, k, v))
    s = jnp.einsum('bhnd,bhmd->bhnm', (q * scale).astype(bf), k.astype(bf),
                   preferred_element_type=f32)
    m = jnp.max(s, axis=-1, keepdims=True)
    p = jnp.exp(s - m)
    l = jnp.sum(p, axis=-1, keepdims=True)
    o = jnp.einsum('bhnm,bhmd->bhnd', p.astype(bf), v.astype(bf),
                   preferred_element_type=f32) / l
    o = o.transpose(0, 2, 1, 3).reshape(b, n, inner)
    return jnp.dot(o.astype(bf), wout.astype(bf), preferred_element_type=f32) + bout


if __name__ == "__main__":
    key = jax.random.PRNGKey(0)

    B, N, DIM = 2, 16, 64
    HEADS, DIM_HEAD, FACTOR = 4, 32, 2
    INNER = HEADS * DIM_HEAD                   # 128
    DOUT = DIM * FACTOR                        # 128 (lane-dense output)

    kx, kq, ko, kb = jax.random.split(key, 4)
    x = jax.random.normal(kx, (B, N, DIM), jnp.float32)
    wqkv = jax.random.normal(kq, (DIM, 3 * INNER), jnp.float32) / math.sqrt(DIM)
    wout = jax.random.normal(ko, (INNER, DOUT), jnp.float32) / math.sqrt(INNER)
    bout = 0.1 * jax.random.normal(kb, (DOUT,), jnp.float32)

    out = attention_forward(x, wqkv, wout, bout, heads=HEADS, dim_head=DIM_HEAD)
    out = jax.block_until_ready(out)
    assert out.shape == (B, N, DOUT), out.shape
    assert bool(jnp.all(jnp.isfinite(out)))

    # Tight check vs a reference using the same bf16-operand / f32-acc numerics.
    ref_bf16 = attention_reference_bf16(x, wqkv, wout, bout,
                                        heads=HEADS, dim_head=DIM_HEAD)
    err_bf16 = float(jnp.max(jnp.abs(out - ref_bf16)))
    assert err_bf16 < 2e-2, f"max abs error vs bf16-matched reference: {err_bf16}"

    # Loose check vs the exact f32 module semantics (bf16 MXU operands lose ~8 mantissa bits).
    ref_f32 = attention_reference_f32(x, wqkv, wout, bout,
                                      heads=HEADS, dim_head=DIM_HEAD)
    err_f32 = float(jnp.max(jnp.abs(out - ref_f32)))
    assert err_f32 < 1e-1, f"max abs error vs f32 reference: {err_f32}"

    print("KERNEL_OK")
</pallas_src>

<mosaic_0001>
module attributes {stable_mosaic.version = 11 : i64} {
  func.func @_attention_kernel(%arg0: i32, %arg1: memref<32x64xf32, #tpu.memory_space<vmem>>, %arg2: memref<64x384xf32, #tpu.memory_space<vmem>>, %arg3: memref<128x128xf32, #tpu.memory_space<vmem>>, %arg4: memref<1x128xf32, #tpu.memory_space<vmem>>, %arg5: memref<32x128xf32, #tpu.memory_space<vmem>>) attributes {dimension_semantics = [#tpu.dimension_semantics<parallel>], iteration_bounds = array<i64: 1>, scalar_prefetch = 0 : i64, scratch_operands = 0 : i64, tpu.core_type = #tpu.core_type<tc>, window_params = [{transform_indices = @transform_0, window_bounds = array<i64: 32, 64>}, {pipeline_mode = #tpu.pipeline_mode<synchronous>, transform_indices = @transform_1, window_bounds = array<i64: 64, 384>}, {pipeline_mode = #tpu.pipeline_mode<synchronous>, transform_indices = @transform_2, window_bounds = array<i64: 128, 128>}, {pipeline_mode = #tpu.pipeline_mode<synchronous>, transform_indices = @transform_3, window_bounds = array<i64: 1, 128>}, {transform_indices = @transform_4, window_bounds = array<i64: 32, 128>}]} {
    %c0 = arith.constant 0 : index
    %c0_0 = arith.constant 0 : index
    %0 = vector.load %arg2[%c0, %c0_0] : memref<64x384xf32, #tpu.memory_space<vmem>>, vector<64x384xf32>
    %1 = arith.truncf %0 : vector<64x384xf32> to vector<64x384xbf16>
    %c0_1 = arith.constant 0 : index
    %c0_2 = arith.constant 0 : index
    %2 = vector.load %arg1[%c0_1, %c0_2] : memref<32x64xf32, #tpu.memory_space<vmem>>, vector<32x64xf32>
    %3 = arith.truncf %2 : vector<32x64xf32> to vector<32x64xbf16>
    %cst = arith.constant dense<0.000000e+00> : vector<32x384xf32>
    %4 = tpu.matmul %3, %1, %cst {dimension_numbers = #tpu.dot_dimension_numbers<[1], [0], [0], [1], [0, 0, 1, 1], [], []>} : vector<32x64xbf16>, vector<64x384xbf16>, vector<32x384xf32> -> vector<32x384xf32>
    %c0_3 = arith.constant 0 : index
    %c0_4 = arith.constant 0 : index
    %5 = vector.load %arg3[%c0_3, %c0_4] : memref<128x128xf32, #tpu.memory_space<vmem>>, vector<128x128xf32>
    %6 = arith.truncf %5 : vector<128x128xf32> to vector<128x128xbf16>
    %c0_5 = arith.constant 0 : index
    %c0_6 = arith.constant 0 : index
    %7 = vector.load %arg4[%c0_5, %c0_6] : memref<1x128xf32, #tpu.memory_space<vmem>>, vector<1x128xf32>
    %8 = vector.extract_strided_slice %4 {offsets = [0, 0], sizes = [16, 384], strides = [1, 1]} : vector<32x384xf32> to vector<16x384xf32>
    %9 = vector.extract_strided_slice %8 {offsets = [0, 0], sizes = [16, 32], strides = [1, 1]} : vector<16x384xf32> to vector<16x32xf32>
    %cst_7 = arith.constant 0.176776692 : f32
    %10 = vector.broadcast %cst_7 : f32 to vector<16x32xf32>
    %11 = arith.mulf %9, %10 : vector<16x32xf32>
    %12 = arith.truncf %11 : vector<16x32xf32> to vector<16x32xbf16>
    %13 = vector.extract_strided_slice %8 {offsets = [0, 128], sizes = [16, 32], strides = [1, 1]} : vector<16x384xf32> to vector<16x32xf32>
    %14 = arith.truncf %13 : vector<16x32xf32> to vector<16x32xbf16>
    %15 = vector.extract_strided_slice %8 {offsets = [0, 256], sizes = [16, 32], strides = [1, 1]} : vector<16x384xf32> to vector<16x32xf32>
    %16 = arith.truncf %15 : vector<16x32xf32> to vector<16x32xbf16>
    %cst_8 = arith.constant dense<0.000000e+00> : vector<16x16xf32>
    %17 = tpu.matmul %12, %14, %cst_8 {dimension_numbers = #tpu.dot_dimension_numbers<[1], [1], [0], [0], [0, 0, 1, 0], [], []>} : vector<16x32xbf16>, vector<16x32xbf16>, vector<16x16xf32> -> vector<16x16xf32>
    %cst_9 = arith.constant dense<0xFF800000> : vector<16xf32>
    %18 = vector.multi_reduction <maximumf>, %17, %cst_9 [1] : vector<16x16xf32> to vector<16xf32>
    %19 = vector.shape_cast %18 : vector<16xf32> to vector<16x1xf32>
    %20 = vector.broadcast %19 : vector<16x1xf32> to vector<16x16xf32>
    %21 = arith.subf %17, %20 : vector<16x16xf32>
    %22 = math.exp %21 : vector<16x16xf32>
    %cst_10 = arith.constant dense<0.000000e+00> : vector<16xf32>
    %23 = vector.multi_reduction <add>, %22, %cst_10 [1] : vector<16x16xf32> to vector<16xf32>
    %24 = vector.shape_cast %23 : vector<16xf32> to vector<16x1xf32>
    %25 = arith.truncf %22 : vector<16x16xf32> to vector<16x16xbf16>
    %cst_11 = arith.constant dense<0.000000e+00> : vector<16x32xf32>
    %26 = tpu.matmul %25, %16, %cst_11 {dimension_numbers = #tpu.dot_dimension_numbers<[1], [0], [0], [1], [0, 0, 1, 1], [], []>} : vector<16x16xbf16>, vector<16x32xbf16>, vector<16x32xf32> -> vector<16x32xf32>
    %27 = tpu.reciprocal %24 {approx = true} : vector<16x1xf32> -> vector<16x1xf32>
    %28 = vector.broadcast %27 : vector<16x1xf32> to vector<16x32xf32>
    %29 = arith.mulf %26, %28 : vector<16x32xf32>
    %30 = vector.extract_strided_slice %8 {offsets = [0, 32], sizes = [16, 32], strides = [1, 1]} : vector<16x384xf32> to vector<16x32xf32>
    %cst_12 = arith.constant 0.176776692 : f32
    %31 = vector.broadcast %cst_12 : f32 to vector<16x32xf32>
    %32 = arith.mulf %30, %31 : vector<16x32xf32>
    %33 = arith.truncf %32 : vector<16x32xf32> to vector<16x32xbf16>
    %34 = vector.extract_strided_slice %8 {offsets = [0, 160], sizes = [16, 32], strides = [1, 1]} : vector<16x384xf32> to vector<16x32xf32>
    %35 = arith.truncf %34 : vector<16x32xf32> to vector<16x32xbf16>
    %36 = vector.extract_strided_slice %8 {offsets = [0, 288], sizes = [16, 32], strides = [1, 1]} : vector<16x384xf32> to vector<16x32xf32>
    %37 = arith.truncf %36 : vector<16x32xf32> to vector<16x32xbf16>
    %cst_13 = arith.constant dense<0.000000e+00> : vector<16x16xf32>
    %38 = tpu.matmul %33, %35, %cst_13 {dimension_numbers = #tpu.dot_dimension_numbers<[1], [1], [0], [0], [0, 0, 1, 0], [], []>} : vector<16x32xbf16>, vector<16x32xbf16>, vector<16x16xf32> -> vector<16x16xf32>
    %cst_14 = arith.constant dense<0xFF800000> : vector<16xf32>
    %39 = vector.multi_reduction <maximumf>, %38, %cst_14 [1] : vector<16x16xf32> to vector<16xf32>
    %40 = vector.shape_cast %39 : vector<16xf32> to vector<16x1xf32>
    %41 = vector.broadcast %40 : vector<16x1xf32> to vector<16x16xf32>
    %42 = arith.subf %38, %41 : vector<16x16xf32>
    %43 = math.exp %42 : vector<16x16xf32>
    %cst_15 = arith.constant dense<0.000000e+00> : vector<16xf32>
    %44 = vector.multi_reduction <add>, %43, %cst_15 [1] : vector<16x16xf32> to vector<16xf32>
    %45 = vector.shape_cast %44 : vector<16xf32> to vector<16x1xf32>
    %46 = arith.truncf %43 : vector<16x16xf32> to vector<16x16xbf16>
    %cst_16 = arith.constant dense<0.000000e+00> : vector<16x32xf32>
    %47 = tpu.matmul %46, %37, %cst_16 {dimension_numbers = #tpu.dot_dimension_numbers<[1], [0], [0], [1], [0, 0, 1, 1], [], []>} : vector<16x16xbf16>, vector<16x32xbf16>, vector<16x32xf32> -> vector<16x32xf32>
    %48 = tpu.reciprocal %45 {approx = true} : vector<16x1xf32> -> vector<16x1xf32>
    %49 = vector.broadcast %48 : vector<16x1xf32> to vector<16x32xf32>
    %50 = arith.mulf %47, %49 : vector<16x32xf32>
    %51 = vector.extract_strided_slice %8 {offsets = [0, 64], sizes = [16, 32], strides = [1, 1]} : vector<16x384xf32> to vector<16x32xf32>
    %cst_17 = arith.constant 0.176776692 : f32
    %52 = vector.broadcast %cst_17 : f32 to vector<16x32xf32>
    %53 = arith.mulf %51, %52 : vector<16x32xf32>
    %54 = arith.truncf %53 : vector<16x32xf32> to vector<16x32xbf16>
    %55 = vector.extract_strided_slice %8 {offsets = [0, 192], sizes = [16, 32], strides = [1, 1]} : vector<16x384xf32> to vector<16x32xf32>
    %56 = arith.truncf %55 : vector<16x32xf32> to vector<16x32xbf16>
    %57 = vector.extract_strided_slice %8 {offsets = [0, 320], sizes = [16, 32], strides = [1, 1]} : vector<16x384xf32> to vector<16x32xf32>
    %58 = arith.truncf %57 : vector<16x32xf32> to vector<16x32xbf16>
    %cst_18 = arith.constant dense<0.000000e+00> : vector<16x16xf32>
    %59 = tpu.matmul %54, %56, %cst_18 {dimension_numbers = #tpu.dot_dimension_numbers<[1], [1], [0], [0], [0, 0, 1, 0], [], []>} : vector<16x32xbf16>, vector<16x32xbf16>, vector<16x16xf32> -> vector<16x16xf32>
    %cst_19 = arith.constant dense<0xFF800000> : vector<16xf32>
    %60 = vector.multi_reduction <maximumf>, %59, %cst_19 [1] : vector<16x16xf32> to vector<16xf32>
    %61 = vector.shape_cast %60 : vector<16xf32> to vector<16x1xf32>
    %62 = vector.broadcast %61 : vector<16x1xf32> to vector<16x16xf32>
    %63 = arith.subf %59, %62 : vector<16x16xf32>
    %64 = math.exp %63 : vector<16x16xf32>
    %cst_20 = arith.constant dense<0.000000e+00> : vector<16xf32>
    %65 = vector.multi_reduction <add>, %64, %cst_20 [1] : vector<16x16xf32> to vector<16xf32>
    %66 = vector.shape_cast %65 : vector<16xf32> to vector<16x1xf32>
    %67 = arith.truncf %64 : vector<16x16xf32> to vector<16x16xbf16>
    %cst_21 = arith.constant dense<0.000000e+00> : vector<16x32xf32>
    %68 = tpu.matmul %67, %58, %cst_21 {dimension_numbers = #tpu.dot_dimension_numbers<[1], [0], [0], [1], [0, 0, 1, 1], [], []>} : vector<16x16xbf16>, vector<16x32xbf16>, vector<16x32xf32> -> vector<16x32xf32>
    %69 = tpu.reciprocal %66 {approx = true} : vector<16x1xf32> -> vector<16x1xf32>
    %70 = vector.broadcast %69 : vector<16x1xf32> to vector<16x32xf32>
    %71 = arith.mulf %68, %70 : vector<16x32xf32>
    %72 = vector.extract_strided_slice %8 {offsets = [0, 96], sizes = [16, 32], strides = [1, 1]} : vector<16x384xf32> to vector<16x32xf32>
    %cst_22 = arith.constant 0.176776692 : f32
    %73 = vector.broadcast %cst_22 : f32 to vector<16x32xf32>
    %74 = arith.mulf %72, %73 : vector<16x32xf32>
    %75 = arith.truncf %74 : vector<16x32xf32> to vector<16x32xbf16>
    %76 = vector.extract_strided_slice %8 {offsets = [0, 224], sizes = [16, 32], strides = [1, 1]} : vector<16x384xf32> to vector<16x32xf32>
    %77 = arith.truncf %76 : vector<16x32xf32> to vector<16x32xbf16>
    %78 = vector.extract_strided_slice %8 {offsets = [0, 352], sizes = [16, 32], strides = [1, 1]} : vector<16x384xf32> to vector<16x32xf32>
    %79 = arith.truncf %78 : vector<16x32xf32> to vector<16x32xbf16>
    %cst_23 = arith.constant dense<0.000000e+00> : vector<16x16xf32>
    %80 = tpu.matmul %75, %77, %cst_23 {dimension_numbers = #tpu.dot_dimension_numbers<[1], [1], [0], [0], [0, 0, 1, 0], [], []>} : vector<16x32xbf16>, vector<16x32xbf16>, vector<16x16xf32> -> vector<16x16xf32>
    %cst_24 = arith.constant dense<0xFF800000> : vector<16xf32>
    %81 = vector.multi_reduction <maximumf>, %80, %cst_24 [1] : vector<16x16xf32> to vector<16xf32>
    %82 = vector.shape_cast %81 : vector<16xf32> to vector<16x1xf32>
    %83 = vector.broadcast %82 : vector<16x1xf32> to vector<16x16xf32>
    %84 = arith.subf %80, %83 : vector<16x16xf32>
    %85 = math.exp %84 : vector<16x16xf32>
    %cst_25 = arith.constant dense<0.000000e+00> : vector<16xf32>
    %86 = vector.multi_reduction <add>, %85, %cst_25 [1] : vector<16x16xf32> to vector<16xf32>
    %87 = vector.shape_cast %86 : vector<16xf32> to vector<16x1xf32>
    %88 = arith.truncf %85 : vector<16x16xf32> to vector<16x16xbf16>
    %cst_26 = arith.constant dense<0.000000e+00> : vector<16x32xf32>
    %89 = tpu.matmul %88, %79, %cst_26 {dimension_numbers = #tpu.dot_dimension_numbers<[1], [0], [0], [1], [0, 0, 1, 1], [], []>} : vector<16x16xbf16>, vector<16x32xbf16>, vector<16x32xf32> -> vector<16x32xf32>
    %90 = tpu.reciprocal %87 {approx = true} : vector<16x1xf32> -> vector<16x1xf32>
    %91 = vector.broadcast %90 : vector<16x1xf32> to vector<16x32xf32>
    %92 = arith.mulf %89, %91 : vector<16x32xf32>
    %93 = tpu.concatenate %29, %50, %71, %92 in 1 : vector<16x32xf32>, vector<16x32xf32>, vector<16x32xf32>, vector<16x32xf32> -> vector<16x128xf32>
    %94 = arith.truncf %93 : vector<16x128xf32> to vector<16x128xbf16>
    %cst_27 = arith.constant dense<0.000000e+00> : vector<16x128xf32>
    %95 = tpu.matmul %94, %6, %cst_27 {dimension_numbers = #tpu.dot_dimension_numbers<[1], [0], [0], [1], [0, 0, 1, 1], [], []>} : vector<16x128xbf16>, vector<128x128xbf16>, vector<16x128xf32> -> vector<16x128xf32>
    %96 = vector.broadcast %7 : vector<1x128xf32> to vector<16x128xf32>
    %97 = arith.addf %95, %96 : vector<16x128xf32>
    %c0_28 = arith.constant 0 : index
    %c0_29 = arith.constant 0 : index
    %98 = vector.load %arg5[%c0_28, %c0_29] : memref<32x128xf32, #tpu.memory_space<vmem>>, vector<16x128xf32>
    tpu.vector_store %arg5[%c0_28, %c0_29], %97 {strides = array<i32>} : memref<32x128xf32, #tpu.memory_space<vmem>>, vector<16x128xf32>,
    %99 = vector.extract_strided_slice %4 {offsets = [16, 0], sizes = [16, 384], strides = [1, 1]} : vector<32x384xf32> to vector<16x384xf32>
    %100 = vector.extract_strided_slice %99 {offsets = [0, 0], sizes = [16, 32], strides = [1, 1]} : vector<16x384xf32> to vector<16x32xf32>
    %cst_30 = arith.constant 0.176776692 : f32
    %101 = vector.broadcast %cst_30 : f32 to vector<16x32xf32>
    %102 = arith.mulf %100, %101 : vector<16x32xf32>
    %103 = arith.truncf %102 : vector<16x32xf32> to vector<16x32xbf16>
    %104 = vector.extract_strided_slice %99 {offsets = [0, 128], sizes = [16, 32], strides = [1, 1]} : vector<16x384xf32> to vector<16x32xf32>
    %105 = arith.truncf %104 : vector<16x32xf32> to vector<16x32xbf16>
    %106 = vector.extract_strided_slice %99 {offsets = [0, 256], sizes = [16, 32], strides = [1, 1]} : vector<16x384xf32> to vector<16x32xf32>
    %107 = arith.truncf %106 : vector<16x32xf32> to vector<16x32xbf16>
    %cst_31 = arith.constant dense<0.000000e+00> : vector<16x16xf32>
    %108 = tpu.matmul %103, %105, %cst_31 {dimension_numbers = #tpu.dot_dimension_numbers<[1], [1], [0], [0], [0, 0, 1, 0], [], []>} : vector<16x32xbf16>, vector<16x32xbf16>, vector<16x16xf32> -> vector<16x16xf32>
    %cst_32 = arith.constant dense<0xFF800000> : vector<16xf32>
    %109 = vector.multi_reduction <maximumf>, %108, %cst_32 [1] : vector<16x16xf32> to vector<16xf32>
    %110 = vector.shape_cast %109 : vector<16xf32> to vector<16x1xf32>
    %111 = vector.broadcast %110 : vector<16x1xf32> to vector<16x16xf32>
    %112 = arith.subf %108, %111 : vector<16x16xf32>
    %113 = math.exp %112 : vector<16x16xf32>
    %cst_33 = arith.constant dense<0.000000e+00> : vector<16xf32>
    %114 = vector.multi_reduction <add>, %113, %cst_33 [1] : vector<16x16xf32> to vector<16xf32>
    %115 = vector.shape_cast %114 : vector<16xf32> to vector<16x1xf32>
    %116 = arith.truncf %113 : vector<16x16xf32> to vector<16x16xbf16>
    %cst_34 = arith.constant dense<0.000000e+00> : vector<16x32xf32>
    %117 = tpu.matmul %116, %107, %cst_34 {dimension_numbers = #tpu.dot_dimension_numbers<[1], [0], [0], [1], [0, 0, 1, 1], [], []>} : vector<16x16xbf16>, vector<16x32xbf16>, vector<16x32xf32> -> vector<16x32xf32>
    %118 = tpu.reciprocal %115 {approx = true} : vector<16x1xf32> -> vector<16x1xf32>
    %119 = vector.broadcast %118 : vector<16x1xf32> to vector<16x32xf32>
    %120 = arith.mulf %117, %119 : vector<16x32xf32>
    %121 = vector.extract_strided_slice %99 {offsets = [0, 32], sizes = [16, 32], strides = [1, 1]} : vector<16x384xf32> to vector<16x32xf32>
    %cst_35 = arith.constant 0.176776692 : f32
    %122 = vector.broadcast %cst_35 : f32 to vector<16x32xf32>
    %123 = arith.mulf %121, %122 : vector<16x32xf32>
    %124 = arith.truncf %123 : vector<16x32xf32> to vector<16x32xbf16>
    %125 = vector.extract_strided_slice %99 {offsets = [0, 160], sizes = [16, 32], strides = [1, 1]} : vector<16x384xf32> to vector<16x32xf32>
    %126 = arith.truncf %125 : vector<16x32xf32> to vector<16x32xbf16>
    %127 = vector.extract_strided_slice %99 {offsets = [0, 288], sizes = [16, 32], strides = [1, 1]} : vector<16x384xf32> to vector<16x32xf32>
    %128 = arith.truncf %127 : vector<16x32xf32> to vector<16x32xbf16>
    %cst_36 = arith.constant dense<0.000000e+00> : vector<16x16xf32>
    %129 = tpu.matmul %124, %126, %cst_36 {dimension_numbers = #tpu.dot_dimension_numbers<[1], [1], [0], [0], [0, 0, 1, 0], [], []>} : vector<16x32xbf16>, vector<16x32xbf16>, vector<16x16xf32> -> vector<16x16xf32>
    %cst_37 = arith.constant dense<0xFF800000> : vector<16xf32>
    %130 = vector.multi_reduction <maximumf>, %129, %cst_37 [1] : vector<16x16xf32> to vector<16xf32>
    %131 = vector.shape_cast %130 : vector<16xf32> to vector<16x1xf32>
    %132 = vector.broadcast %131 : vector<16x1xf32> to vector<16x16xf32>
    %133 = arith.subf %129, %132 : vector<16x16xf32>
    %134 = math.exp %133 : vector<16x16xf32>
    %cst_38 = arith.constant dense<0.000000e+00> : vector<16xf32>
    %135 = vector.multi_reduction <add>, %134, %cst_38 [1] : vector<16x16xf32> to vector<16xf32>
    %136 = vector.shape_cast %135 : vector<16xf32> to vector<16x1xf32>
    %137 = arith.truncf %134 : vector<16x16xf32> to vector<16x16xbf16>
    %cst_39 = arith.constant dense<0.000000e+00> : vector<16x32xf32>
    %138 = tpu.matmul %137, %128, %cst_39 {dimension_numbers = #tpu.dot_dimension_numbers<[1], [0], [0], [1], [0, 0, 1, 1], [], []>} : vector<16x16xbf16>, vector<16x32xbf16>, vector<16x32xf32> -> vector<16x32xf32>
    %139 = tpu.reciprocal %136 {approx = true} : vector<16x1xf32> -> vector<16x1xf32>
    %140 = vector.broadcast %139 : vector<16x1xf32> to vector<16x32xf32>
    %141 = arith.mulf %138, %140 : vector<16x32xf32>
    %142 = vector.extract_strided_slice %99 {offsets = [0, 64], sizes = [16, 32], strides = [1, 1]} : vector<16x384xf32> to vector<16x32xf32>
    %cst_40 = arith.constant 0.176776692 : f32
    %143 = vector.broadcast %cst_40 : f32 to vector<16x32xf32>
    %144 = arith.mulf %142, %143 : vector<16x32xf32>
    %145 = arith.truncf %144 : vector<16x32xf32> to vector<16x32xbf16>
    %146 = vector.extract_strided_slice %99 {offsets = [0, 192], sizes = [16, 32], strides = [1, 1]} : vector<16x384xf32> to vector<16x32xf32>
    %147 = arith.truncf %146 : vector<16x32xf32> to vector<16x32xbf16>
    %148 = vector.extract_strided_slice %99 {offsets = [0, 320], sizes = [16, 32], strides = [1, 1]} : vector<16x384xf32> to vector<16x32xf32>
    %149 = arith.truncf %148 : vector<16x32xf32> to vector<16x32xbf16>
    %cst_41 = arith.constant dense<0.000000e+00> : vector<16x16xf32>
    %150 = tpu.matmul %145, %147, %cst_41 {dimension_numbers = #tpu.dot_dimension_numbers<[1], [1], [0], [0], [0, 0, 1, 0], [], []>} : vector<16x32xbf16>, vector<16x32xbf16>, vector<16x16xf32> -> vector<16x16xf32>
    %cst_42 = arith.constant dense<0xFF800000> : vector<16xf32>
    %151 = vector.multi_reduction <maximumf>, %150, %cst_42 [1] : vector<16x16xf32> to vector<16xf32>
    %152 = vector.shape_cast %151 : vector<16xf32> to vector<16x1xf32>
    %153 = vector.broadcast %152 : vector<16x1xf32> to vector<16x16xf32>
    %154 = arith.subf %150, %153 : vector<16x16xf32>
    %155 = math.exp %154 : vector<16x16xf32>
    %cst_43 = arith.constant dense<0.000000e+00> : vector<16xf32>
    %156 = vector.multi_reduction <add>, %155, %cst_43 [1] : vector<16x16xf32> to vector<16xf32>
    %157 = vector.shape_cast %156 : vector<16xf32> to vector<16x1xf32>
    %158 = arith.truncf %155 : vector<16x16xf32> to vector<16x16xbf16>
    %cst_44 = arith.constant dense<0.000000e+00> : vector<16x32xf32>
    %159 = tpu.matmul %158, %149, %cst_44 {dimension_numbers = #tpu.dot_dimension_numbers<[1], [0], [0], [1], [0, 0, 1, 1], [], []>} : vector<16x16xbf16>, vector<16x32xbf16>, vector<16x32xf32> -> vector<16x32xf32>
    %160 = tpu.reciprocal %157 {approx = true} : vector<16x1xf32> -> vector<16x1xf32>
    %161 = vector.broadcast %160 : vector<16x1xf32> to vector<16x32xf32>
    %162 = arith.mulf %159, %161 : vector<16x32xf32>
    %163 = vector.extract_strided_slice %99 {offsets = [0, 96], sizes = [16, 32], strides = [1, 1]} : vector<16x384xf32> to vector<16x32xf32>
    %cst_45 = arith.constant 0.176776692 : f32
    %164 = vector.broadcast %cst_45 : f32 to vector<16x32xf32>
    %165 = arith.mulf %163, %164 : vector<16x32xf32>
    %166 = arith.truncf %165 : vector<16x32xf32> to vector<16x32xbf16>
    %167 = vector.extract_strided_slice %99 {offsets = [0, 224], sizes = [16, 32], strides = [1, 1]} : vector<16x384xf32> to vector<16x32xf32>
    %168 = arith.truncf %167 : vector<16x32xf32> to vector<16x32xbf16>
    %169 = vector.extract_strided_slice %99 {offsets = [0, 352], sizes = [16, 32], strides = [1, 1]} : vector<16x384xf32> to vector<16x32xf32>
    %170 = arith.truncf %169 : vector<16x32xf32> to vector<16x32xbf16>
    %cst_46 = arith.constant dense<0.000000e+00> : vector<16x16xf32>
    %171 = tpu.matmul %166, %168, %cst_46 {dimension_numbers = #tpu.dot_dimension_numbers<[1], [1], [0], [0], [0, 0, 1, 0], [], []>} : vector<16x32xbf16>, vector<16x32xbf16>, vector<16x16xf32> -> vector<16x16xf32>
    %cst_47 = arith.constant dense<0xFF800000> : vector<16xf32>
    %172 = vector.multi_reduction <maximumf>, %171, %cst_47 [1] : vector<16x16xf32> to vector<16xf32>
    %173 = vector.shape_cast %172 : vector<16xf32> to vector<16x1xf32>
    %174 = vector.broadcast %173 : vector<16x1xf32> to vector<16x16xf32>
    %175 = arith.subf %171, %174 : vector<16x16xf32>
    %176 = math.exp %175 : vector<16x16xf32>
    %cst_48 = arith.constant dense<0.000000e+00> : vector<16xf32>
    %177 = vector.multi_reduction <add>, %176, %cst_48 [1] : vector<16x16xf32> to vector<16xf32>
    %178 = vector.shape_cast %177 : vector<16xf32> to vector<16x1xf32>
    %179 = arith.truncf %176 : vector<16x16xf32> to vector<16x16xbf16>
    %cst_49 = arith.constant dense<0.000000e+00> : vector<16x32xf32>
    %180 = tpu.matmul %179, %170, %cst_49 {dimension_numbers = #tpu.dot_dimension_numbers<[1], [0], [0], [1], [0, 0, 1, 1], [], []>} : vector<16x16xbf16>, vector<16x32xbf16>, vector<16x32xf32> -> vector<16x32xf32>
    %181 = tpu.reciprocal %178 {approx = true} : vector<16x1xf32> -> vector<16x1xf32>
    %182 = vector.broadcast %181 : vector<16x1xf32> to vector<16x32xf32>
    %183 = arith.mulf %180, %182 : vector<16x32xf32>
    %184 = tpu.concatenate %120, %141, %162, %183 in 1 : vector<16x32xf32>, vector<16x32xf32>, vector<16x32xf32>, vector<16x32xf32> -> vector<16x128xf32>
    %185 = arith.truncf %184 : vector<16x128xf32> to vector<16x128xbf16>
    %cst_50 = arith.constant dense<0.000000e+00> : vector<16x128xf32>
    %186 = tpu.matmul %185, %6, %cst_50 {dimension_numbers = #tpu.dot_dimension_numbers<[1], [0], [0], [1], [0, 0, 1, 1], [], []>} : vector<16x128xbf16>, vector<128x128xbf16>, vector<16x128xf32> -> vector<16x128xf32>
    %187 = vector.broadcast %7 : vector<1x128xf32> to vector<16x128xf32>
    %188 = arith.addf %186, %187 : vector<16x128xf32>
    %c16 = arith.constant 16 : index
    %c0_51 = arith.constant 0 : index
    %189 = vector.load %arg5[%c16, %c0_51] : memref<32x128xf32, #tpu.memory_space<vmem>>, vector<16x128xf32>
    tpu.vector_store %arg5[%c16, %c0_51], %188 {strides = array<i32>} : memref<32x128xf32, #tpu.memory_space<vmem>>, vector<16x128xf32>,
    return
  }
  func.func @transform_0(%arg0: i32) -> (i32, i32) {
    %c0_i32 = arith.constant 0 : i32
    %c0_i32_0 = arith.constant 0 : i32
    return %arg0, %c0_i32 : i32, i32
  }
  func.func @transform_1(%arg0: i32) -> (i32, i32) {
    %c0_i32 = arith.constant 0 : i32
    %c0_i32_0 = arith.constant 0 : i32
    %c0_i32_1 = arith.constant 0 : i32
    return %c0_i32, %c0_i32_0 : i32, i32
  }
  func.func @transform_2(%arg0: i32) -> (i32, i32) {
    %c0_i32 = arith.constant 0 : i32
    %c0_i32_0 = arith.constant 0 : i32
    %c0_i32_1 = arith.constant 0 : i32
    return %c0_i32, %c0_i32_0 : i32, i32
  }
  func.func @transform_3(%arg0: i32) -> (i32, i32) {
    %c0_i32 = arith.constant 0 : i32
    %c0_i32_0 = arith.constant 0 : i32
    %c0_i32_1 = arith.constant 0 : i32
    return %c0_i32, %c0_i32_0 : i32, i32
  }
  func.func @transform_4(%arg0: i32) -> (i32, i32) {
    %c0_i32 = arith.constant 0 : i32
    %c0_i32_0 = arith.constant 0 : i32
    return %arg0, %c0_i32 : i32, i32
  }
}

</mosaic_0001>

<bundles_post_ra>
// kernel: tpu_custom_call.1
= control target key start
LH: loop header
LB: loop body
LE: loop exit
PB: predicated region body
PF: predicated region fallthrough
CT: control target
= control target key end

     0   :  { %9 = vsyncpa [#allocation3], 0  ;;  %s2128_s0 = inlined_call_operand.hbm [shape: f32[32,64], index: 0, kind: input, shape index: {}]   ;;  %s2129_s1 = inlined_call_operand.hbm [shape: f32[64,384], index: 1, kind: input, shape index: {}]   ;;  %s2130_s2 = inlined_call_operand.hbm [shape: f32[128,128], index: 2, kind: input, shape index: {}]   ;;  %s2131_s3 = inlined_call_operand.vmem [shape: f32[1,128], index: 3, kind: input, shape index: {}]   ;;  %s2132_s4 = inlined_call_operand.hbm [shape: f32[32,128], index: 4, kind: output, shape index: {}]  }
   0x1   :  { %10 = vsyncpa [#allocation6], 0 }
   0x2   :  { %11 = vsyncpa [#allocation4], 0  ;;  %s1800_s15 = smov [#allocation5]  }
   0x3   :  { %s29_s16 = sshll.u32 %s1800_s15, 4  ;;  %s30_s16 = int_to_ptr.vmem [resolvable:$true] %s29_s16 }
   0x4   :  { %s1722_s17 = scalar_lea.vmem %s30_s16, 3072  ;;  %p1727_p1 = scmp.lt.s32.totalorder %s30_s16, %s30_s16 }
   0x5   :  { %p1723_p0 = scmp.ne.s32.totalorder %s30_s16, %s1722_s17  ;;  %p1728_p2 = scmp.lt.s32.totalorder %s1722_s17, %s1722_s17 }
   0x7   :  { %p1729_p3 = por %p1728_p2, %p1727_p1 }
   0x9   :  { %p1730_p4 = pnand %p1729_p3, %p1723_p0 }
   0xb   :  { %1733 = shalt.err (!%p1730_p4)
}
   0xc   :  { %s1801_s18 = smov 384   ;;  %s1802_s19 = smov 24  }
   0xd   :  { %35 = dma.hbm_to_vmem [thread:$0]  %s2129_s1, 3072, %s30_s16, [#allocation6], %s1801_s18, %s1801_s18, %s1802_s19  }
   0xe   :  { %s1803_s22 = smov [#allocation2]  }
   0xf   :  { %s17_s23 = sshll.u32 %s1803_s22, 4  ;;  %s18_s23 = int_to_ptr.vmem [resolvable:$true] %s17_s23 }
  0x10   :  { %s1742_s24 = scalar_lea.vmem %s18_s23, 512  ;;  %p1747_p6 = scmp.lt.s32.totalorder %s18_s23, %s18_s23 }
  0x11   :  { %p1743_p5 = scmp.ne.s32.totalorder %s18_s23, %s1742_s24  ;;  %p1748_p7 = scmp.lt.s32.totalorder %s1742_s24, %s1742_s24 }
  0x13   :  { %p1749_p8 = por %p1748_p7, %p1747_p6 }
  0x15   :  { %p1750_p9 = pnand %p1749_p8, %p1743_p5 }
  0x17   :  { %1753 = shalt.err (!%p1750_p9)
}
  0x18   :  { %s1804_s25 = smov 128   ;;  %s1805_s26 = smov 8  }
  0x19   :  { %23 = dma.hbm_to_vmem [thread:$0]  %s2128_s0, 512, %s18_s23, [#allocation3], %s1804_s25, %s1804_s25, %s1805_s26  }
  0x1a   :  { %s1806_s1 = smov [#allocation7]  }
  0x1b   :  { %s41_s29 = sshll.u32 %s1806_s1, 4  ;;  %s42_s29 = int_to_ptr.vmem [resolvable:$true] %s41_s29 }
  0x1c   :  { %s1762_s30 = scalar_lea.vmem %s42_s29, 2048  ;;  %p1767_p11 = scmp.lt.s32.totalorder %s42_s29, %s42_s29 }
  0x1d   :  { %p1763_p10 = scmp.ne.s32.totalorder %s42_s29, %s1762_s30  ;;  %p1768_p12 = scmp.lt.s32.totalorder %s1762_s30, %s1762_s30 }
  0x1f   :  { %p1769_p13 = por %p1768_p12, %p1767_p11 }
  0x21   :  { %p1770_p0 = pnand %p1769_p13, %p1763_p10 }
  0x23   :  { %1773 = shalt.err (!%p1770_p0)
}
  0x24   :  { %47 = dma.hbm_to_vmem [thread:$0]  %s2130_s2, 2048, %s42_s29, [#allocation6], %s1804_s25, %s1804_s25, %s1805_s26  }
  0x25   :  { %1794 = dma.done.wait [#allocation3], 512  }
  0x26   :  { %1795 = vsyncadd [#allocation3], 4294966784 }
  0x27   :  { %1796 = dma.done.wait [#allocation6], 5120  }
  0x28   :  { %1797 = vsyncadd [#allocation6], 4294962176  ;;  %v1807_v0 = vmov 0   ;;  %v79_v1 = vld [vmem:[#allocation5 + $0x98] sm:$0xff]  ;;  %v82_v2 = vld [vmem:[#allocation5 + $0xb0] sm:$0xff]  ;;  %vm102_vm0 = vcmask 523264  }
  0x29   :  { %141 = vmatprep.mubr.bf16.mxu0 %v1807_v0  ;;  %v78_v3 = vld [vmem:[#allocation5 + $0x90] sm:$0xff]  ;;  %v94_v4 = vpack.c.bf16 %v82_v2, %v79_v1  ;;  %v81_v5 = vld [vmem:[#allocation5 + $0xa8] sm:$0xff]  ;;  %v76_v7 = vld [vmem:[#allocation5 + $0x80] sm:$0xff]  ;;  %v1808_v28 = vmov 0.0   ;;  %vm1809_vm1 = vmmov 0   ;;  %vm241_vm2 = vcmask 261120  }
  0x2a   :  { %v73_v6 = vld [vmem:[#allocation5 + $0x68] sm:$0xff]  ;;  %v93_v8 = vpack.c.bf16 %v81_v5, %v78_v3  ;;  %v72_v10 = vld [vmem:[#allocation5 + $0x60] sm:$0xff]  ;;  %v75_v11 = vld [vmem:[#allocation5 + $0x78] sm:$0xff]  ;;  %1470 = vmatprep.subr.bf16.mxu1 %v1808_v28  ;;  %1472 = vmatprep.mubr.msk.bf16.mxu1 %vm1809_vm1, %v1808_v28  ;;  %s1810_s0 = smov 64   ;;  %s1811_s2 = smov 96   ;;  %vm289_vm3 = vcmask 130048  }
  0x2b   :  { %v91_v9 = vpack.c.bf16 %v76_v7, %v73_v6  ;;  %v67_v12 = vld [vmem:[#allocation5 + $0x38] sm:$0xff]  ;;  %117 = vmatprep.subr.bf16.mxu0 %v94_v4  ;;  %v70_v13 = vld [vmem:[#allocation5 + $0x50] sm:$0xff]  ;;  %v90_v14 = vpack.c.bf16 %v75_v11, %v72_v10  ;;  %v69_v17 = vld [vmem:[#allocation5 + $0x48] sm:$0xff]  ;;  %s1812_s7 = smov 32   ;;  %vm751_vm4 = vcmask 785408  }
  0x2c   :  { %118 = vmatpush1.bf16.msra.mxu0 %v93_v8  ;;  %v88_v15 = vpack.c.bf16 %v70_v13, %v67_v12  ;;  %v66_v16 = vld [vmem:[#allocation5 + $0x30] sm:$0xff]  ;;  %v61_v18 = vld [vmem:[#allocation5 + $0x8] sm:$0xff]  ;;  %v64_v19 = vld [vmem:[#allocation5 + $0x20] sm:$0xff] }
  0x2d   :  { %119 = vmatprep.subr.bf16.mxu0 %v91_v9  ;;  %v87_v20 = vpack.c.bf16 %v69_v17, %v66_v16  ;;  %v85_v21 = vpack.c.bf16 %v64_v19, %v61_v18  ;;  %v60_v22 = vld [vmem:[#allocation5] sm:$0xff]  ;;  %v63_v23 = vld [vmem:[#allocation5 + $0x18] sm:$0xff]  ;;  %v97_v26 = vld [vmem:[#allocation2 + $0x8] sm:$0xff] }
  0x2e   :  { %v84_v24 = vpack.c.bf16 %v63_v23, %v60_v22  ;;  %v96_v25 = vld [vmem:[#allocation2] sm:$0xff]  ;;  %v83_v30 = vld [vmem:[#allocation5 + $0xb8] sm:$0xff]  ;;  %v74_v31 = vld [vmem:[#allocation5 + $0x70] sm:$0xff] }
  0x2f   :  { %v100_v27 = vpack.c.bf16 %v97_v26, %v96_v25  ;;  %v80_v29 = vld [vmem:[#allocation5 + $0xa0] sm:$0xff]  ;;  %v77_v33 = vld [vmem:[#allocation5 + $0x88] sm:$0xff]  ;;  %v98_v34 = vld [vmem:[#allocation2 + $0x10] sm:$0xff] }
  0x30   :  { %120 = vmatpush1.bf16.msra.mxu0 %v90_v14  ;;  %v95_v32 = vpack.c.bf16 %v83_v30, %v80_v29  ;;  %v99_v35 = vld [vmem:[#allocation2 + $0x18] sm:$0xff]  ;;  %v92_v36 = vpack.c.bf16 %v77_v33, %v74_v31  ;;  %v68_v38 = vld [vmem:[#allocation5 + $0x40] sm:$0xff]  ;;  %v62_v41 = vld [vmem:[#allocation5 + $0x10] sm:$0xff] }
  0x31   :  { %121 = vmatprep.subr.bf16.mxu0 %v88_v15  ;;  %v101_v37 = vpack.c.bf16 %v99_v35, %v98_v34  ;;  %v71_v39 = vld [vmem:[#allocation5 + $0x58] sm:$0xff]  ;;  %v65_v42 = vld [vmem:[#allocation5 + $0x28] sm:$0xff] }
  0x32   :  { %v89_v40 = vpack.c.bf16 %v71_v39, %v68_v38  ;;  %v86_v43 = vpack.c.bf16 %v65_v42, %v62_v41 }
  0x34   :  { %122 = vmatpush1.bf16.msra.mxu0 %v87_v20 }
  0x35   :  { %123 = vmatprep.subr.bf16.mxu0 %v85_v21 }
  0x38   :  { %124 = vmatpush1.bf16.msra.mxu0 %v84_v24 }
  0x39   :  { %1458 = vmatprep.subr.bf16.mxu0 %v95_v32 }
  0x3b   :  { %1381 = vmatmul.mubr.msk.bf16.vlgmr.msra.gmra.mxu0 %vm102_vm0, %v100_v27 }
  0x3c   :  { %151 = vmatprep.mubr.bf16.mxu0 %v1807_v0  ;;  %1459 = vmatpush3.bf16.msra.mxu0 %v95_v32 }
  0x3d   :  { %1460 = vmatprep.subr.bf16.mxu0 %v92_v36 }
  0x40   :  { %1461 = vmatpush3.bf16.msra.mxu0 %v92_v36 }
  0x41   :  { %1462 = vmatprep.subr.bf16.mxu0 %v89_v40 }
  0x43   :  { %1382 = vmatmul.mubr.msk.bf16.gmra.mxu0 %vm102_vm0, %v101_v37 }
  0x44   :  { %1466 = vmatprep.mubr.msk.bf16.mxu0 %vm102_vm0, %v100_v27  ;;  %1463 = vmatpush3.bf16.msra.mxu0 %v89_v40 }
  0x45   :  { %1464 = vmatprep.subr.bf16.mxu0 %v86_v43 }
  0x48   :  { %1465 = vmatpush3.bf16.msra.mxu0 %v86_v43 }
  0x49   :  { %1476 = vmatprep.subr.bf16.mxu0 %v1808_v28 }
  0x4b   :  { %1467 = vmatmul.mubr.msk.bf16.vlgmr.msra.gmra.mxu0 %vm102_vm0, %v101_v37 }
  0x4c   :  { %1478 = vmatprep.mubr.msk.bf16.mxu0 %vm1809_vm1, %v1808_v28 }
  0xfb   :  { %v143_v44 = vpop.f32.mrf.mxu0 }
  0xfc   :  { %v236_v50 = vmul.f32 0.17677669, %v143_v44 }
  0xfd   :  { %v145_v45 = vpop.f32.mrf.mxu0 }
  0xff   :  { %v147_v46 = vpop.f32.mrf.mxu0 }
 0x100   :  { %v237_v48 = vmul.f32 0.17677669, %v147_v46 }
 0x101   :  { %v149_v47 = vpop.f32.mrf.mxu0 }
 0x102   :  { %v239_v49 = vpack.c.bf16 %v149_v47, %v145_v45  ;;  %v238_v52 = vpack.c.bf16 %v237_v48, %v236_v50 }
 0x103   :  { %v153_v53 = vpop.f32.mrf.mxu0 }
 0x104   :  { %483 = vrot.lane.b32.xlu1 %v239_v49, %s1810_s0  ;;  %361 = vrot.lane.b32.xlu0 %v239_v49, %s1811_s2  ;;  %v246_v51 = vsel %vm241_vm2, %v239_v49, 0  ;;  %v804_v55 = vmul.f32 0.17677669, %v153_v53 }
 0x105   :  { %1471 = vmatpush3.bf16.xpose.msra.mxu1 %v246_v51  ;;  %v155_v54 = vpop.f32.mrf.mxu0 }
 0x106   :  { %1482 = vmatprep.subr.bf16.mxu1 %v1808_v28 }
 0x107   :  { %v157_v56 = vpop.f32.mrf.mxu0 }
 0x108   :  { %481 = vrot.lane.b32.xlu1 %v238_v52, %s1810_s0  ;;  %358 = vrot.lane.b32.xlu0 %v238_v52, %s1811_s2  ;;  %v805_v57 = vmul.f32 0.17677669, %v157_v56 }
 0x109   :  { %v159_v58 = vpop.f32.mrf.mxu0 }
 0x10a   :  { %v1875_v59 = vpack.c.bf16 %v805_v57, %v804_v55  ;;  %v1877_v60 = vpack.c.bf16 %v159_v58, %v155_v54 }
 0x10b   :  { %v1468_v61 = vpop.f32.mrf.mxu0 }
 0x10c   :  { %602 = vrot.lane.b32.xlu1 %v238_v52, %s1812_s7  ;;  %604 = vrot.lane.b32.xlu0 %v239_v49, %s1812_s7 }
 0x10d   :  { %1473 = vmatmul.mubr.msk.bf16.vlgmr.msra.gmra.mxu1 %vm241_vm2, %v238_v52  ;;  %v196_v62 = vpop.f32.mrf.mxu0 }
 0x10e   :  { %1484 = vmatprep.mubr.msk.bf16.mxu1 %vm1809_vm1, %v1808_v28 }
 0x10f   :  { %v1469_v63 = vpop.f32.mrf.mxu0 }
 0x110   :  { %v1879_v0 = vpack.c.bf16 %v1469_v63, %v1468_v61 }
 0x111   :  { %v199_v1 = vpop.f32.mrf.mxu0 }
 0x112   :  { %v1881_v2 = vpack.c.bf16 %v199_v1, %v196_v62 }
 0x114   :  { %1477 = vmatpush3.bf16.msra.mxu0 %v1881_v2 }
 0x115   :  { %1488 = vmatprep.subr.bf16.mxu0 %v1808_v28 }
 0x176   :  { %v362_v3 = vpop.permute.xlu0 %361  ;;  %v484_v5 = vpop.permute.xlu1 %483 }
 0x177   :  { %v367_v4 = vsel %vm241_vm2, %v362_v3, 0  ;;  %v489_v7 = vsel %vm241_vm2, %v484_v5, 0 }
 0x178   :  { %1483 = vmatpush3.bf16.xpose.msra.mxu1 %v367_v4 }
 0x179   :  { %1494 = vmatprep.subr.bf16.mxu1 %v1808_v28 }
 0x17a   :  { %v359_v6 = vpop.permute.xlu0 %358  ;;  %v482_v9 = vpop.permute.xlu1 %481 }
 0x17e   :  { %v605_v8 = vpop.permute.xlu0 %604  ;;  %v603_v11 = vpop.permute.xlu1 %602 }
 0x17f   :  { %1485 = vmatmul.mubr.msk.bf16.vlgmr.msra.gmra.mxu1 %vm241_vm2, %v359_v6  ;;  %v610_v10 = vsel %vm241_vm2, %v605_v8, 0 }
 0x180   :  { %1495 = vmatpush3.bf16.xpose.msra.mxu1 %v489_v7  ;;  %1496 = vmatprep.mubr.msk.bf16.mxu1 %vm1809_vm1, %v1808_v28 }
 0x181   :  { %1506 = vmatprep.subr.bf16.mxu1 %v1808_v28 }
 0x187   :  { %1497 = vmatmul.mubr.msk.bf16.vlgmr.msra.gmra.mxu1 %vm241_vm2, %v482_v9 }
 0x188   :  { %1507 = vmatpush3.bf16.xpose.msra.mxu1 %v610_v10  ;;  %1508 = vmatprep.mubr.msk.bf16.mxu1 %vm1809_vm1, %v1808_v28 }
 0x189   :  { %1518 = vmatprep.subr.bf16.mxu1 %v1808_v28 }
 0x18f   :  { %1509 = vmatmul.mubr.msk.bf16.vlgmr.msra.gmra.mxu1 %vm241_vm2, %v603_v11 }
 0x190   :  { %1534 = vmatprep.mubr.msk.bf16.mxu1 %vm1809_vm1, %v1808_v28 }
 0x1cd   :  { %v282_v12 = vpop.f32.mrf.mxu1 }
 0x1ce   :  { %v290_v13 = vsel %vm289_vm3, %v282_v12, -inf }
 0x1cf   :  { %291 = vmax.xlane.f32.xlu0 %v290_v13  ;;  %v1474_v14 = vpop.f32.mrf.mxu1 }
 0x1d1   :  { %v285_v15 = vpop.f32.mrf.mxu1 }
 0x1d2   :  { %v293_v16 = vsel %vm289_vm3, %v285_v15, -inf }
 0x1d3   :  { %294 = vmax.xlane.f32.xlu1 %v293_v16  ;;  %v1475_v17 = vpop.f32.mrf.mxu1 }
 0x1e4   :  { %430 = vrot.lane.b32.xlu1 %v1881_v2, %s1811_s2 }
 0x23f   :  { %v403_v18 = vpop.f32.mrf.mxu1 }
 0x240   :  { %v410_v19 = vsel %vm289_vm3, %v403_v18, -inf }
 0x241   :  { %411 = vmax.xlane.f32.xlu0 %v410_v19  ;;  %v1486_v20 = vpop.f32.mrf.mxu1 }
 0x243   :  { %v406_v21 = vpop.f32.mrf.mxu1 }
 0x244   :  { %v413_v22 = vsel %vm289_vm3, %v406_v21, -inf }
 0x245   :  { %414 = vmax.xlane.f32.xlu0 %v413_v22  ;;  %v1487_v23 = vpop.f32.mrf.mxu1 }
 0x247   :  { %v525_v24 = vpop.f32.mrf.mxu1 }
 0x248   :  { %v532_v25 = vsel %vm289_vm3, %v525_v24, -inf }
 0x249   :  { %v1498_v26 = vpop.f32.mrf.mxu1  ;;  %533 = vmax.xlane.f32.xlu1 %v532_v25 }
 0x24b   :  { %v528_v27 = vpop.f32.mrf.mxu1 }
 0x24c   :  { %v535_v29 = vsel %vm289_vm3, %v528_v27, -inf }
 0x24d   :  { %536 = vmax.xlane.f32.xlu0 %v535_v29  ;;  %v1499_v30 = vpop.f32.mrf.mxu1 }
 0x24e   :  { %v225_v30 = vld [vmem:[#allocation7 + $0x70] sm:$0xff] }
 0x24f   :  { %v646_v31 = vpop.f32.mrf.mxu1 }
 0x250   :  { %v653_v32 = vsel %vm289_vm3, %v646_v31, -inf }
 0x251   :  { %v1510_v33 = vpop.f32.mrf.mxu1  ;;  %654 = vmax.xlane.f32.xlu1 %v653_v32 }
 0x253   :  { %v649_v34 = vpop.f32.mrf.mxu1 }
 0x254   :  { %v656_v35 = vsel %vm289_vm3, %v649_v34, -inf }
 0x255   :  { %657 = vmax.xlane.f32.xlu0 %v656_v35  ;;  %v1511_v36 = vpop.f32.mrf.mxu1 }
 0x258   :  { %v292_v37 = vpop.xlane.xlu0 %291 }
 0x259   :  { %v296_v38 = vsub.f32 %v282_v12, %v292_v37 }
 0x25b   :  { %v298_v39 = vmul.f32 1.442695, %v296_v38 }
 0x25c   :  { %v295_v40 = vpop.xlane.xlu1 %294 }
 0x25d   :  { %v297_v41 = vsub.f32 %v285_v15, %v295_v40  ;;  %1650 = vpow2.f32 %v298_v39 }
 0x25f   :  { %v300_v42 = vmul.f32 1.442695, %v297_v41 }
 0x260   :  { %v431_v46 = vpop.permute.xlu1 %430 }
 0x261   :  { %1652 = vpow2.f32 %v300_v42 }
 0x262   :  { %672 = vrot.lane.b32.xlu1 %v1881_v2, %s1812_s7 }
 0x26a   :  { %v1914_v43 = vpop.eup %1650 }
 0x26b   :  { %551 = vrot.lane.b32.xlu0 %v1881_v2, %s1810_s0 }
 0x26e   :  { %v1916_v44 = vpop.eup %1652 }
 0x26f   :  { %v308_v45 = vpack.c.bf16 %v1916_v44, %v1914_v43  ;;  %v305_v22 = vsel %vm289_vm3, %v1916_v44, 0.0 }
 0x271   :  { %1479 = vmatmul.mubr.msk.bf16.vlgmr.msra.gmra.mxu0 %vm289_vm3, %v308_v45 }
 0x272   :  { %1489 = vmatpush3.bf16.msra.mxu0 %v431_v46  ;;  %1490 = vmatprep.mubr.msk.bf16.mxu0 %vm1809_vm1, %v1808_v28 }
 0x273   :  { %1500 = vmatprep.subr.bf16.mxu0 %v1808_v28 }
 0x2ca   :  { %v412_v47 = vpop.xlane.xlu0 %411 }
 0x2cb   :  { %v416_v48 = vsub.f32 %v403_v18, %v412_v47 }
 0x2cd   :  { %v418_v49 = vmul.f32 1.442695, %v416_v48 }
 0x2ce   :  { %v415_v50 = vpop.xlane.xlu0 %414 }
 0x2cf   :  { %1654 = vpow2.f32 %v418_v49  ;;  %v417_v51 = vsub.f32 %v406_v21, %v415_v50  ;;  %v813_v21 = vsel %vm241_vm2, %v1877_v60, 0 }
 0x2d1   :  { %v420_v52 = vmul.f32 1.442695, %v417_v51 }
 0x2d2   :  { %v534_v53 = vpop.xlane.xlu1 %533 }
 0x2d3   :  { %1656 = vpow2.f32 %v420_v52  ;;  %v538_v54 = vsub.f32 %v525_v24, %v534_v53 }
 0x2d5   :  { %v540_v55 = vmul.f32 1.442695, %v538_v54 }
 0x2d6   :  { %v537_v56 = vpop.xlane.xlu0 %536 }
 0x2d7   :  { %1658 = vpow2.f32 %v540_v55  ;;  %v539_v57 = vsub.f32 %v528_v27, %v537_v56  ;;  %v302_v56 = vsel %vm289_vm3, %v1914_v43, 0.0  ;;  %v219_v43 = vld [vmem:[#allocation7 + $0x40] sm:$0xff] }
 0x2d9   :  { %v542_v58 = vmul.f32 1.442695, %v539_v57 }
 0x2da   :  { %v655_v61 = vpop.xlane.xlu1 %654 }
 0x2db   :  { %1660 = vpow2.f32 %v542_v58  ;;  %v659_v62 = vsub.f32 %v646_v31, %v655_v61  ;;  %v226_v31 = vld [vmem:[#allocation7 + $0x78] sm:$0xff] }
 0x2dc   :  { %v1655_v63 = vpop.eup %1654  ;;  %v1956_v32 = vpack.c.bf16 %v226_v31, %v225_v30  ;;  %v211_v30 = vld [vmem:[#allocation7] sm:$0xff]  ;;  %v212_v31 = vld [vmem:[#allocation7 + $0x8] sm:$0xff] }
 0x2dd   :  { %v661_v1 = vmul.f32 1.442695, %v659_v62  ;;  %v422_v2 = vsel %vm289_vm3, %v1655_v63, 0.0 }
 0x2de   :  { %v658_v3 = vpop.xlane.xlu0 %657  ;;  %423 = vadd.xlane.f32.xlu1 %v422_v2  ;;  %v673_v15 = vpop.permute.xlu1 %672  ;;  %1519 = vmatpush3.bf16.msra.mxu1 %v1956_v32 }
 0x2df   :  { %1662 = vpow2.f32 %v661_v1  ;;  %v660_v4 = vsub.f32 %v649_v34, %v658_v3  ;;  %1520 = vmatprep.subr.bf16.mxu1 %v1808_v28  ;;  %v224_v1 = vld [vmem:[#allocation7 + $0x68] sm:$0xff]  ;;  %v221_v3 = vld [vmem:[#allocation7 + $0x50] sm:$0xff] }
 0x2e0   :  { %v1657_v5 = vpop.eup %1656 }
 0x2e1   :  { %v663_v6 = vmul.f32 1.442695, %v660_v4  ;;  %v425_v7 = vsel %vm289_vm3, %v1657_v5, 0.0  ;;  %v428_v8 = vpack.c.bf16 %v1657_v5, %v1655_v63  ;;  %v223_v63 = vld [vmem:[#allocation7 + $0x60] sm:$0xff]  ;;  %v222_v4 = vld [vmem:[#allocation7 + $0x58] sm:$0xff] }
 0x2e2   :  { %426 = vadd.xlane.f32.xlu0 %v425_v7  ;;  %v552_v9 = vpop.permute.xlu0 %551  ;;  %v1971_v2 = vpack.c.bf16 %v224_v1, %v223_v63  ;;  %v1975_v5 = vpack.c.bf16 %v222_v4, %v221_v3 }
 0x2e3   :  { %1664 = vpow2.f32 %v663_v6  ;;  %1491 = vmatmul.mubr.msk.bf16.vlgmr.msra.gmra.mxu0 %vm289_vm3, %v428_v8  ;;  %v220_v6 = vld [vmem:[#allocation7 + $0x48] sm:$0xff] }
 0x2e4   :  { %v1659_v10 = vpop.eup %1658  ;;  %1501 = vmatpush3.bf16.msra.mxu0 %v552_v9  ;;  %1502 = vmatprep.mubr.msk.bf16.mxu0 %vm1809_vm1, %v1808_v28  ;;  %v1981_v8 = vpack.c.bf16 %v220_v6, %v219_v43  ;;  %v217_v9 = vld [vmem:[#allocation7 + $0x30] sm:$0xff] }
 0x2e5   :  { %v544_v11 = vsel %vm289_vm3, %v1659_v10, 0.0  ;;  %1512 = vmatprep.subr.bf16.mxu0 %v1808_v28  ;;  %1521 = vmatpush3.bf16.msra.mxu1 %v1971_v2 }
 0x2e6   :  { %545 = vadd.xlane.f32.xlu0 %v544_v11  ;;  %1522 = vmatprep.subr.bf16.mxu1 %v1808_v28 }
 0x2e8   :  { %v1661_v12 = vpop.eup %1660 }
 0x2e9   :  { %v547_v13 = vsel %vm289_vm3, %v1661_v12, 0.0  ;;  %v550_v14 = vpack.c.bf16 %v1661_v12, %v1659_v10  ;;  %1523 = vmatpush3.bf16.msra.mxu1 %v1975_v5  ;;  %v218_v10 = vld [vmem:[#allocation7 + $0x38] sm:$0xff] }
 0x2ea   :  { %548 = vadd.xlane.f32.xlu1 %v547_v13  ;;  %1524 = vmatprep.subr.bf16.mxu1 %v1808_v28  ;;  %v1985_v11 = vpack.c.bf16 %v218_v10, %v217_v9 }
 0x2eb   :  { %1503 = vmatmul.mubr.msk.bf16.vlgmr.msra.gmra.mxu0 %vm289_vm3, %v550_v14 }
 0x2ec   :  { %v1663_v16 = vpop.eup %1662  ;;  %1513 = vmatpush3.bf16.msra.mxu0 %v673_v15  ;;  %1514 = vmatprep.mubr.msk.bf16.mxu0 %vm1809_vm1, %v1808_v28  ;;  %v215_v15 = vld [vmem:[#allocation7 + $0x20] sm:$0xff] }
 0x2ed   :  { %v665_v17 = vsel %vm289_vm3, %v1663_v16, 0.0  ;;  %1538 = vmatprep.subr.bf16.mxu0 %v1808_v28  ;;  %1525 = vmatpush3.bf16.msra.mxu1 %v1981_v8 }
 0x2ee   :  { %666 = vadd.xlane.f32.xlu0 %v665_v17  ;;  %1526 = vmatprep.subr.bf16.mxu1 %v1808_v28 }
 0x2f0   :  { %v1665_v18 = vpop.eup %1664 }
 0x2f1   :  { %v668_v19 = vsel %vm289_vm3, %v1665_v18, 0.0  ;;  %v671_v20 = vpack.c.bf16 %v1665_v18, %v1663_v16  ;;  %1527 = vmatpush3.bf16.msra.mxu1 %v1985_v11  ;;  %v216_v16 = vld [vmem:[#allocation7 + $0x28] sm:$0xff] }
 0x2f2   :  { %669 = vadd.xlane.f32.xlu1 %v668_v19  ;;  %1528 = vmatprep.subr.bf16.mxu1 %v1808_v28  ;;  %v1991_v18 = vpack.c.bf16 %v216_v16, %v215_v15 }
 0x2f3   :  { %1515 = vmatmul.mubr.msk.bf16.vlgmr.msra.gmra.mxu0 %vm289_vm3, %v671_v20 }
 0x2f4   :  { %1539 = vmatpush3.bf16.xpose.msra.mxu0 %v813_v21  ;;  %1540 = vmatprep.mubr.msk.bf16.mxu0 %vm1809_vm1, %v1808_v28  ;;  %v213_v21 = vld [vmem:[#allocation7 + $0x10] sm:$0xff] }
 0x2f5   :  { %1544 = vmatprep.subr.bf16.mxu0 %v1808_v28  ;;  %1529 = vmatpush3.bf16.msra.mxu1 %v1991_v18 }
 0x2f6   :  { %306 = vadd.xlane.f32.xlu1 %v305_v22  ;;  %1530 = vmatprep.subr.bf16.mxu1 %v1808_v28  ;;  %v214_v22 = vld [vmem:[#allocation7 + $0x18] sm:$0xff] }
 0x2fb   :  { %1541 = vmatmul.mubr.msk.bf16.vlgmr.msra.gmra.mxu0 %vm241_vm2, %v1875_v59 }
 0x2fc   :  { %1545 = vmatpush3.bf16.msra.mxu0 %v1879_v0  ;;  %1546 = vmatprep.mubr.msk.bf16.mxu0 %vm1809_vm1, %v1808_v28 }
 0x2fd   :  { %1550 = vmatprep.subr.bf16.mxu0 %v1808_v28 }
 0x331   :  { %v1952_v23 = vpop.f32.mrf.mxu0 }
 0x333   :  { %v1480_v24 = vpop.f32.mrf.mxu0 }
 0x335   :  { %v1954_v25 = vpop.f32.mrf.mxu0 }
 0x337   :  { %v1481_v26 = vpop.f32.mrf.mxu0 }
 0x338   :  { %v1996_v26 = vpack.c.bf16 %v214_v22, %v213_v21 }
 0x33a   :  { %1531 = vmatpush3.bf16.msra.mxu1 %v1996_v26 }
 0x33b   :  { %1532 = vmatprep.subr.bf16.mxu1 %v1808_v28 }
 0x367   :  { %v424_v27 = vpop.xlane.xlu1 %423 }
 0x368   :  { %1666 = vrcp.f32 %v424_v27 }
 0x36b   :  { %v427_v29 = vpop.xlane.xlu0 %426 }
 0x36c   :  { %1668 = vrcp.f32 %v427_v29 }
 0x36f   :  { %v546_v58 = vpop.xlane.xlu0 %545 }
 0x373   :  { %v549_v55 = vpop.xlane.xlu1 %548 }
 0x375   :  { %v1667_v35 = vpop.eup %1666 }
 0x377   :  { %v667_v62 = vpop.xlane.xlu0 %666 }
 0x379   :  { %v1669_v36 = vpop.eup %1668 }
 0x37b   :  { %v670_v61 = vpop.xlane.xlu1 %669 }
 0x37c   :  { %1670 = vrcp.f32 %v670_v61 }
 0x37d   :  { %1672 = vrcp.f32 %v667_v62 }
 0x37e   :  { %1674 = vrcp.f32 %v549_v55 }
 0x37f   :  { %1676 = vrcp.f32 %v546_v58 }
 0x389   :  { %v1671_v12 = vpop.eup %1670 }
 0x38a   :  { %v1673_v14 = vpop.eup %1672 }
 0x38b   :  { %v1675_v20 = vpop.eup %1674 }
 0x38c   :  { %v1677_v27 = vpop.eup %1676 }
 0x3a3   :  { %v470_v33 = vpop.f32.mrf.mxu0 }
 0x3a4   :  { %v479_v38 = vmul.f32 %v1667_v35, %v470_v33 }
 0x3a5   :  { %v1492_v34 = vpop.f32.mrf.mxu0 }
 0x3a6   :  { %v2003_v34 = vpack.c.bf16 %v212_v31, %v211_v30 }
 0x3a7   :  { %v473_v37 = vpop.f32.mrf.mxu0 }
 0x3a8   :  { %v480_v39 = vmul.f32 %v1669_v36, %v473_v37  ;;  %1533 = vmatpush3.bf16.msra.mxu1 %v2003_v34  ;;  %v307_v36 = vpop.xlane.xlu1 %306 }
 0x3a9   :  { %v1493_v40 = vpop.f32.mrf.mxu0  ;;  %1562 = vmatprep.subr.bf16.mxu1 %v1808_v28 }
 0x3aa   :  { %v1620_v41 = vpack.i.bf16 %v480_v39, %v479_v38 }
 0x3ab   :  { %v1960_v42 = vpop.f32.mrf.mxu0 }
 0x3ac   :  { %1621 = vrot.lane.b32.xlu1 %v1620_v41, %s1812_s7  ;;  %v600_v29 = vmul.f32 %v1677_v27, %v1960_v42 }
 0x3ad   :  { %v1504_v44 = vpop.f32.mrf.mxu0 }
 0x3af   :  { %v594_v45 = vpop.f32.mrf.mxu0 }
 0x3b0   :  { %v601_v24 = vmul.f32 %v1675_v20, %v594_v45 }
 0x3b1   :  { %v1505_v46 = vpop.f32.mrf.mxu0 }
 0x3b2   :  { %v1625_v33 = vpack.i.bf16 %v601_v24, %v600_v29 }
 0x3b3   :  { %v712_v47 = vpop.f32.mrf.mxu0 }
 0x3b4   :  { %v721_v17 = vmul.f32 %v1673_v14, %v712_v47 }
 0x3b5   :  { %v1516_v48 = vpop.f32.mrf.mxu0 }
 0x3b7   :  { %v715_v49 = vpop.f32.mrf.mxu0 }
 0x3b8   :  { %v722_v13 = vmul.f32 %v1671_v12, %v715_v49 }
 0x3b9   :  { %v1517_v50 = vpop.f32.mrf.mxu0 }
 0x3ba   :  { %v1630_v19 = vpack.i.bf16 %v722_v13, %v721_v17 }
 0x3bb   :  { %v1963_v51 = vpop.f32.mrf.mxu0 }
 0x3bc   :  { %v856_v52 = vsel %vm289_vm3, %v1963_v51, -inf }
 0x3bd   :  { %857 = vmax.xlane.f32.xlu0 %v856_v52  ;;  %v1542_v53 = vpop.f32.mrf.mxu0 }
 0x3bf   :  { %v1967_v54 = vpop.f32.mrf.mxu0 }
 0x3c0   :  { %v859_v7 = vsel %vm289_vm3, %v1967_v54, -inf }
 0x3c1   :  { %303 = vadd.xlane.f32.xlu0 %v302_v56  ;;  %v1543_v57 = vpop.f32.mrf.mxu0 }
 0x3d0   :  { %860 = vmax.xlane.f32.xlu1 %v859_v7 }
 0x3d7   :  { %927 = vrot.lane.b32.xlu0 %v1877_v60, %s1811_s2 }
 0x3db   :  { %1631 = vrot.lane.b32.xlu0 %v1630_v19, %s1811_s2 }
 0x3df   :  { %1049 = vrot.lane.b32.xlu0 %v1877_v60, %s1810_s0 }
 0x3e1   :  { %1626 = vrot.lane.b32.xlu1 %v1625_v33, %s1810_s0 }
 0x3e3   :  { %1170 = vrot.lane.b32.xlu0 %v1877_v60, %s1812_s7 }
 0x3e5   :  { %924 = vrot.lane.b32.xlu1 %v1875_v59, %s1811_s2 }
 0x3e9   :  { %1047 = vrot.lane.b32.xlu1 %v1875_v59, %s1810_s0 }
 0x3ed   :  { %1168 = vrot.lane.b32.xlu1 %v1875_v59, %s1812_s7 }
 0x41e   :  { %v1622_v38 = vpop.permute.xlu1 %1621 }
 0x41f   :  { %v1624_v46 = vunpack.i.h.bf16 %v1622_v38  ;;  %v1623_v50 = vunpack.i.l.bf16 %v1622_v38 }
 0x446   :  { %v858_v35 = vpop.xlane.xlu0 %857 }
 0x447   :  { %v862_v39 = vsub.f32 %v1963_v51, %v858_v35 }
 0x449   :  { %v864_v60 = vmul.f32 1.442695, %v862_v39 }
 0x44a   :  { %v304_v37 = vpop.xlane.xlu0 %303 }
 0x44b   :  { %1678 = vrcp.f32 %v304_v37 }
 0x44c   :  { %1680 = vrcp.f32 %v307_v36 }
 0x44d   :  { %1682 = vpow2.f32 %v864_v60 }
 0x44e   :  { %v928_v40 = vpop.permute.xlu0 %927 }
 0x44f   :  { %v933_v12 = vsel %vm241_vm2, %v928_v40, 0 }
 0x452   :  { %v1632_v47 = vpop.permute.xlu0 %1631 }
 0x453   :  { %v1634_v56 = vunpack.i.h.bf16 %v1632_v47  ;;  %v1633_v57 = vunpack.i.l.bf16 %v1632_v47 }
 0x456   :  { %v1050_v61 = vpop.permute.xlu0 %1049 }
 0x457   :  { %v1055_v1 = vsel %vm241_vm2, %v1050_v61, 0 }
 0x458   :  { %v1679_v41 = vpop.eup %1678 }
 0x459   :  { %v861_v42 = vpop.xlane.xlu1 %860  ;;  %v1681_v44 = vpop.eup %1680  ;;  %v355_v48 = vmul.f32 %v1679_v41, %v1952_v23 }
 0x45a   :  { %v863_v45 = vsub.f32 %v1967_v54, %v861_v42  ;;  %v356_v49 = vmul.f32 %v1681_v44, %v1954_v25  ;;  %v1171_v4 = vpop.permute.xlu0 %1170  ;;  %v2030_v43 = vpop.eup %1682 }
 0x45b   :  { %v747_v54 = vsel %vm241_vm2, %v355_v48, %v1623_v50  ;;  %v1176_v9 = vsel %vm241_vm2, %v1171_v4, 0 }
 0x45c   :  { %v866_v59 = vmul.f32 1.442695, %v863_v45  ;;  %v748_v55 = vsel %vm241_vm2, %v356_v49, %v1624_v46 }
 0x45d   :  { %v1627_v52 = vpop.permute.xlu1 %1626 }
 0x45e   :  { %1684 = vpow2.f32 %v866_v59  ;;  %v1629_v53 = vunpack.i.h.bf16 %v1627_v52  ;;  %v1628_v51 = vunpack.i.l.bf16 %v1627_v52 }
 0x460   :  { %v750_v58 = vsel %vm102_vm0, %v748_v55, %v1629_v53  ;;  %v749_v23 = vsel %vm102_vm0, %v747_v54, %v1628_v51 }
 0x461   :  { %v752_v25 = vsel %vm751_vm4, %v749_v23, %v1633_v57  ;;  %v753_v62 = vsel %vm751_vm4, %v750_v58, %v1634_v56  ;;  %v925_v3 = vpop.permute.xlu1 %924 }
 0x462   :  { %v754_v63 = vpack.c.bf16 %v753_v62, %v752_v25 }
 0x464   :  { %1535 = vmatmul.mubr.bf16.vlgmr.msra.gmra.mxu1 %v754_v63 }
 0x465   :  { %1563 = vmatpush3.bf16.xpose.msra.mxu1 %v1055_v1  ;;  %1564 = vmatprep.mubr.msk.bf16.mxu1 %vm1809_vm1, %v1808_v28  ;;  %v1048_v7 = vpop.permute.xlu1 %1047 }
 0x466   :  { %1574 = vmatprep.subr.bf16.mxu1 %v1808_v28 }
 0x469   :  { %v1169_v13 = vpop.permute.xlu1 %1168 }
 0x46b   :  { %v2032_v6 = vpop.eup %1684 }
 0x46c   :  { %1565 = vmatmul.mubr.msk.bf16.vlgmr.msra.gmra.mxu1 %vm241_vm2, %v1048_v7  ;;  %v874_v10 = vpack.c.bf16 %v2032_v6, %v2030_v43 }
 0x46d   :  { %1575 = vmatpush3.bf16.xpose.msra.mxu1 %v1176_v9  ;;  %1576 = vmatprep.mubr.msk.bf16.mxu1 %vm1809_vm1, %v1808_v28 }
 0x46e   :  { %1547 = vmatmul.mubr.msk.bf16.vlgmr.msra.gmra.mxu0 %vm289_vm3, %v874_v10  ;;  %1586 = vmatprep.subr.bf16.mxu1 %v1808_v28 }
 0x46f   :  { %1551 = vmatpush3.bf16.xpose.msra.mxu0 %v933_v12  ;;  %1552 = vmatprep.mubr.msk.bf16.mxu0 %vm1809_vm1, %v1808_v28 }
 0x470   :  { %1556 = vmatprep.subr.bf16.mxu0 %v1808_v28 }
 0x474   :  { %1577 = vmatmul.mubr.msk.bf16.vlgmr.msra.gmra.mxu1 %vm241_vm2, %v1169_v13 }
 0x475   :  { %1587 = vmatpush3.bf16.msra.mxu1 %v1956_v32  ;;  %1602 = vmatprep.mubr.msk.bf16.mxu1 %vm1809_vm1, %v1808_v28  ;;  %v2070_v32 = vld [vmem:[%s2131_s3] ss:$0 sm:$0xff]  ;;  %s1813_s3 = smov [#allocation8]  }
 0x476   :  { %1553 = vmatmul.mubr.msk.bf16.vlgmr.msra.gmra.mxu0 %vm241_vm2, %v925_v3  ;;  %1588 = vmatprep.subr.bf16.mxu1 %v1808_v28  ;;  %s1368_s10 = sshll.u32 %s1813_s3, 4  ;;  %s1369_s10 = int_to_ptr.vmem [resolvable:$true] %s1368_s10 }
 0x477   :  { %1558 = vmatprep.mubr.msk.bf16.mxu0 %vm1809_vm1, %v1808_v28  ;;  %s1774_s11 = scalar_lea.vmem %s1369_s10, 512  ;;  %p1779_p2 = scmp.lt.s32.totalorder %s1369_s10, %s1369_s10 }
 0x478   :  { %p1775_p1 = scmp.ne.s32.totalorder %s1369_s10, %s1774_s11  ;;  %p1780_p3 = scmp.lt.s32.totalorder %s1774_s11, %s1774_s11 }
 0x479   :  { %1589 = vmatpush3.bf16.msra.mxu1 %v1971_v2 }
 0x47a   :  { %1590 = vmatprep.subr.bf16.mxu1 %v1808_v28  ;;  %p1781_p4 = por %p1780_p3, %p1779_p2 }
 0x47c   :  { %p1782_p5 = pnand %p1781_p4, %p1775_p1 }
 0x47d   :  { %1591 = vmatpush3.bf16.msra.mxu1 %v1975_v5 }
 0x47e   :  { %1592 = vmatprep.subr.bf16.mxu1 %v1808_v28 }
 0x481   :  { %1593 = vmatpush3.bf16.msra.mxu1 %v1981_v8 }
 0x482   :  { %1594 = vmatprep.subr.bf16.mxu1 %v1808_v28 }
 0x485   :  { %1595 = vmatpush3.bf16.msra.mxu1 %v1985_v11 }
 0x486   :  { %1596 = vmatprep.subr.bf16.mxu1 %v1808_v28 }
 0x489   :  { %1597 = vmatpush3.bf16.msra.mxu1 %v1991_v18 }
 0x48a   :  { %1598 = vmatprep.subr.bf16.mxu1 %v1808_v28 }
 0x48d   :  { %1599 = vmatpush3.bf16.msra.mxu1 %v1996_v26 }
 0x48e   :  { %1600 = vmatprep.subr.bf16.mxu1 %v1808_v28 }
 0x491   :  { %1601 = vmatpush3.bf16.msra.mxu1 %v2003_v34 }
 0x524   :  { %v795_v2 = vpop.f32.mrf.mxu1 }
 0x525   :  { %v796_v5 = vadd.f32 %v2070_v32, %v795_v2 }
 0x526   :  { %v1536_v8 = vpop.f32.mrf.mxu1 }
 0x527   :  { %802 = vst [vmem:[#allocation8] sm:$0xff] %v796_v5  ;;  %v868_v5 = vsel %vm289_vm3, %v2030_v43, 0.0 }
 0x528   :  { %v798_v11 = vpop.f32.mrf.mxu1 }
 0x529   :  { %v799_v14 = vadd.f32 %v2070_v32, %v798_v11 }
 0x52a   :  { %v1537_v15 = vpop.f32.mrf.mxu1 }
 0x52b   :  { %803 = vst [vmem:[#allocation8 + $0x8] sm:$0xff] %v799_v14  ;;  %v871_v14 = vsel %vm289_vm3, %v2032_v6, 0.0 }
 0x52c   :  { %v1091_v16 = vpop.f32.mrf.mxu1 }
 0x52d   :  { %v1098_v17 = vsel %vm289_vm3, %v1091_v16, -inf }
 0x52e   :  { %1099 = vmax.xlane.f32.xlu0 %v1098_v17  ;;  %v2075_v18 = vpop.f32.mrf.mxu0  ;;  %v1566_v19 = vpop.f32.mrf.mxu1 }
 0x530   :  { %v1548_v20 = vpop.f32.mrf.mxu0  ;;  %v1094_v21 = vpop.f32.mrf.mxu1 }
 0x531   :  { %v1101_v38 = vsel %vm289_vm3, %v1094_v21, -inf }
 0x532   :  { %v2077_v22 = vpop.f32.mrf.mxu0  ;;  %v1567_v24 = vpop.f32.mrf.mxu1 }
 0x534   :  { %v1549_v26 = vpop.f32.mrf.mxu0  ;;  %v1212_v27 = vpop.f32.mrf.mxu1 }
 0x535   :  { %v1219_v29 = vsel %vm289_vm3, %v1212_v27, -inf }
 0x536   :  { %1220 = vmax.xlane.f32.xlu1 %v1219_v29  ;;  %v969_v30 = vpop.f32.mrf.mxu0  ;;  %v1578_v31 = vpop.f32.mrf.mxu1 }
 0x537   :  { %v976_v33 = vsel %vm289_vm3, %v969_v30, -inf }
 0x538   :  { %v1215_v34 = vpop.f32.mrf.mxu1  ;;  %977 = vmax.xlane.f32.xlu0 %v976_v33  ;;  %v1554_v35 = vpop.f32.mrf.mxu0 }
 0x539   :  { %v1222_v41 = vsel %vm289_vm3, %v1215_v34, -inf }
 0x53a   :  { %v972_v36 = vpop.f32.mrf.mxu0  ;;  %v1579_v37 = vpop.f32.mrf.mxu1 }
 0x53b   :  { %v979_v39 = vsel %vm289_vm3, %v972_v36, -inf }
 0x53c   :  { %1102 = vmax.xlane.f32.xlu0 %v1101_v38  ;;  %980 = vmax.xlane.f32.xlu1 %v979_v39  ;;  %v1555_v40 = vpop.f32.mrf.mxu0 }
 0x540   :  { %1223 = vmax.xlane.f32.xlu0 %v1222_v41 }
 0x54d   :  { %996 = vrot.lane.b32.xlu1 %v1879_v0, %s1811_s2 }
 0x551   :  { %1238 = vrot.lane.b32.xlu1 %v1879_v0, %s1812_s7 }
 0x556   :  { %1117 = vrot.lane.b32.xlu0 %v1879_v0, %s1810_s0 }
 0x5b7   :  { %v1100_v60 = vpop.xlane.xlu0 %1099 }
 0x5b8   :  { %v1104_v42 = vsub.f32 %v1091_v16, %v1100_v60 }
 0x5ba   :  { %v1106_v44 = vmul.f32 1.442695, %v1104_v42 }
 0x5bc   :  { %1686 = vpow2.f32 %v1106_v44 }
 0x5bf   :  { %v1221_v45 = vpop.xlane.xlu1 %1220 }
 0x5c0   :  { %v1225_v48 = vsub.f32 %v1212_v27, %v1221_v45 }
 0x5c1   :  { %v978_v46 = vpop.xlane.xlu0 %977 }
 0x5c2   :  { %v982_v47 = vsub.f32 %v969_v30, %v978_v46  ;;  %v1227_v57 = vmul.f32 1.442695, %v1225_v48 }
 0x5c4   :  { %v984_v59 = vmul.f32 1.442695, %v982_v47 }
 0x5c5   :  { %v1103_v49 = vpop.xlane.xlu0 %1102  ;;  %v981_v50 = vpop.xlane.xlu1 %980 }
 0x5c6   :  { %v1105_v52 = vsub.f32 %v1094_v21, %v1103_v49  ;;  %v983_v53 = vsub.f32 %v972_v36, %v981_v50  ;;  %1688 = vpow2.f32 %v984_v59 }
 0x5c8   :  { %v1108_v51 = vmul.f32 1.442695, %v1105_v52  ;;  %v986_v55 = vmul.f32 1.442695, %v983_v53 }
 0x5c9   :  { %v1687_v56 = vpop.eup %1686  ;;  %v1224_v54 = vpop.xlane.xlu0 %1223 }
 0x5ca   :  { %v997_v0 = vpop.permute.xlu1 %996  ;;  %1690 = vpow2.f32 %v1108_v51  ;;  %v1226_v58 = vsub.f32 %v1215_v34, %v1224_v54  ;;  %v1110_v23 = vsel %vm289_vm3, %v1687_v56, 0.0 }
 0x5cb   :  { %1557 = vmatpush3.bf16.msra.mxu0 %v997_v0  ;;  %1692 = vpow2.f32 %v986_v55  ;;  %1111 = vadd.xlane.f32.xlu0 %v1110_v23 }
 0x5cc   :  { %1568 = vmatprep.subr.bf16.mxu0 %v1808_v28  ;;  %v1229_v61 = vmul.f32 1.442695, %v1226_v58  ;;  %1694 = vpow2.f32 %v1227_v57 }
 0x5cd   :  { %v1118_v9 = vpop.permute.xlu0 %1117 }
 0x5ce   :  { %1696 = vpow2.f32 %v1229_v61  ;;  %v1239_v11 = vpop.permute.xlu1 %1238 }
 0x5d3   :  { %v1689_v25 = vpop.eup %1688 }
 0x5d4   :  { %v988_v10 = vsel %vm289_vm3, %v1689_v25, 0.0 }
 0x5d7   :  { %v1691_v62 = vpop.eup %1690 }
 0x5d8   :  { %v1693_v63 = vpop.eup %1692  ;;  %v1113_v1 = vsel %vm289_vm3, %v1691_v62, 0.0  ;;  %v1116_v8 = vpack.c.bf16 %v1691_v62, %v1687_v56 }
 0x5d9   :  { %1114 = vadd.xlane.f32.xlu1 %v1113_v1  ;;  %v991_v3 = vsel %vm289_vm3, %v1693_v63, 0.0  ;;  %v994_v4 = vpack.c.bf16 %v1693_v63, %v1689_v25  ;;  %v1695_v7 = vpop.eup %1694 }
 0x5da   :  { %992 = vadd.xlane.f32.xlu0 %v991_v3  ;;  %v1231_v13 = vsel %vm289_vm3, %v1695_v7, 0.0 }
 0x5db   :  { %1559 = vmatmul.mubr.msk.bf16.vlgmr.msra.gmra.mxu0 %vm289_vm3, %v994_v4  ;;  %v1697_v12 = vpop.eup %1696 }
 0x5dc   :  { %1569 = vmatpush3.bf16.msra.mxu0 %v1118_v9  ;;  %1570 = vmatprep.mubr.msk.bf16.mxu0 %vm1809_vm1, %v1808_v28  ;;  %v1234_v2 = vsel %vm289_vm3, %v1697_v12, 0.0  ;;  %v1237_v15 = vpack.c.bf16 %v1697_v12, %v1695_v7 }
 0x5dd   :  { %989 = vadd.xlane.f32.xlu1 %v988_v10  ;;  %1580 = vmatprep.subr.bf16.mxu0 %v1808_v28 }
 0x5de   :  { %1232 = vadd.xlane.f32.xlu0 %v1231_v13 }
 0x5e1   :  { %1235 = vadd.xlane.f32.xlu1 %v1234_v2 }
 0x5e2   :  { %869 = vadd.xlane.f32.xlu0 %v868_v5 }
 0x5e3   :  { %1571 = vmatmul.mubr.msk.bf16.vlgmr.msra.gmra.mxu0 %vm289_vm3, %v1116_v8 }
 0x5e4   :  { %1581 = vmatpush3.bf16.msra.mxu0 %v1239_v11  ;;  %1582 = vmatprep.mubr.msk.bf16.mxu0 %vm1809_vm1, %v1808_v28 }
 0x5e5   :  { %872 = vadd.xlane.f32.xlu1 %v871_v14 }
 0x5eb   :  { %1583 = vmatmul.mubr.msk.bf16.vlgmr.msra.gmra.mxu0 %vm289_vm3, %v1237_v15 }
 0x654   :  { %v1112_v17 = vpop.xlane.xlu0 %1111 }
 0x662   :  { %v1115_v16 = vpop.xlane.xlu1 %1114 }
 0x663   :  { %v993_v19 = vpop.xlane.xlu0 %992 }
 0x664   :  { %1698 = vrcp.f32 %v993_v19 }
 0x666   :  { %v990_v43 = vpop.xlane.xlu1 %989 }
 0x667   :  { %1700 = vrcp.f32 %v990_v43  ;;  %v1233_v26 = vpop.xlane.xlu0 %1232 }
 0x668   :  { %1702 = vrcp.f32 %v1112_v17 }
 0x669   :  { %1704 = vrcp.f32 %v1115_v16 }
 0x66a   :  { %v1236_v27 = vpop.xlane.xlu1 %1235  ;;  %1706 = vrcp.f32 %v1233_v26 }
 0x66b   :  { %1708 = vrcp.f32 %v1236_v27  ;;  %v870_v52 = vpop.xlane.xlu0 %869 }
 0x66c   :  { %1710 = vrcp.f32 %v870_v52 }
 0x66e   :  { %v873_v53 = vpop.xlane.xlu1 %872 }
 0x66f   :  { %1712 = vrcp.f32 %v873_v53 }
 0x671   :  { %v1699_v24 = vpop.eup %1698 }
 0x674   :  { %v1701_v6 = vpop.eup %1700 }
 0x675   :  { %v1703_v36 = vpop.eup %1702 }
 0x676   :  { %v1705_v37 = vpop.eup %1704 }
 0x677   :  { %v1707_v45 = vpop.eup %1706 }
 0x678   :  { %v1709_v46 = vpop.eup %1708 }
 0x679   :  { %v1711_v55 = vpop.eup %1710 }
 0x67a   :  { %v921_v61 = vmul.f32 %v1711_v55, %v2075_v18 }
 0x67c   :  { %v1713_v57 = vpop.eup %1712 }
 0x67d   :  { %v922_v25 = vmul.f32 %v1713_v57, %v2077_v22 }
 0x69b   :  { %v1036_v20 = vpop.f32.mrf.mxu0 }
 0x69c   :  { %v1045_v28 = vmul.f32 %v1701_v6, %v1036_v20 }
 0x69d   :  { %v1560_v21 = vpop.f32.mrf.mxu0 }
 0x69f   :  { %v1039_v29 = vpop.f32.mrf.mxu0 }
 0x6a0   :  { %v1046_v30 = vmul.f32 %v1699_v24, %v1039_v29 }
 0x6a1   :  { %v1561_v31 = vpop.f32.mrf.mxu0 }
 0x6a2   :  { %v1635_v33 = vpack.i.bf16 %v1046_v30, %v1045_v28 }
 0x6a3   :  { %v1157_v34 = vpop.f32.mrf.mxu0 }
 0x6a4   :  { %1636 = vrot.lane.b32.xlu0 %v1635_v33, %s1812_s7  ;;  %v1166_v39 = vmul.f32 %v1703_v36, %v1157_v34 }
 0x6a5   :  { %v1572_v35 = vpop.f32.mrf.mxu0 }
 0x6a7   :  { %v1160_v38 = vpop.f32.mrf.mxu0 }
 0x6a8   :  { %v1167_v40 = vmul.f32 %v1705_v37, %v1160_v38 }
 0x6a9   :  { %v1573_v41 = vpop.f32.mrf.mxu0 }
 0x6aa   :  { %v1640_v60 = vpack.i.bf16 %v1167_v40, %v1166_v39 }
 0x6ab   :  { %v1278_v42 = vpop.f32.mrf.mxu0 }
 0x6ac   :  { %1641 = vrot.lane.b32.xlu1 %v1640_v60, %s1810_s0  ;;  %v1287_v48 = vmul.f32 %v1707_v45, %v1278_v42 }
 0x6ad   :  { %v1584_v44 = vpop.f32.mrf.mxu0 }
 0x6af   :  { %v1281_v47 = vpop.f32.mrf.mxu0 }
 0x6b0   :  { %v1288_v59 = vmul.f32 %v1709_v46, %v1281_v47 }
 0x6b1   :  { %v1585_v49 = vpop.f32.mrf.mxu0 }
 0x6b2   :  { %v1645_v50 = vpack.i.bf16 %v1288_v59, %v1287_v48 }
 0x6b4   :  { %1646 = vrot.lane.b32.xlu1 %v1645_v50, %s1811_s2 }
 0x716   :  { %v1637_v51 = vpop.permute.xlu0 %1636 }
 0x717   :  { %v1639_v54 = vunpack.i.h.bf16 %v1637_v51  ;;  %v1638_v0 = vunpack.i.l.bf16 %v1637_v51 }
 0x719   :  { %v1314_v63 = vsel %vm241_vm2, %v922_v25, %v1639_v54  ;;  %v1313_v1 = vsel %vm241_vm2, %v921_v61, %v1638_v0 }
 0x71e   :  { %v1642_v56 = vpop.permute.xlu1 %1641 }
 0x71f   :  { %v1644_v58 = vunpack.i.h.bf16 %v1642_v56  ;;  %v1643_v23 = vunpack.i.l.bf16 %v1642_v56 }
 0x721   :  { %v1316_v7 = vsel %vm102_vm0, %v1314_v63, %v1644_v58  ;;  %v1315_v9 = vsel %vm102_vm0, %v1313_v1, %v1643_v23 }
 0x726   :  { %v1647_v62 = vpop.permute.xlu1 %1646 }
 0x727   :  { %v1649_v3 = vunpack.i.h.bf16 %v1647_v62  ;;  %v1648_v4 = vunpack.i.l.bf16 %v1647_v62 }
 0x729   :  { %v1318_v10 = vsel %vm751_vm4, %v1316_v7, %v1649_v3  ;;  %v1317_v12 = vsel %vm751_vm4, %v1315_v9, %v1648_v4 }
 0x72a   :  { %v1319_v13 = vpack.c.bf16 %v1318_v10, %v1317_v12 }
 0x72c   :  { %1603 = vmatmul.mubr.bf16.vlgmr.msra.gmra.mxu1 %v1319_v13 }
 0x7ec   :  { %v1354_v18 = vpop.f32.mrf.mxu1 }
 0x7ed   :  { %v1355_v22 = vadd.f32 %v2070_v32, %v1354_v18 }
 0x7ee   :  { %v1604_v2 = vpop.f32.mrf.mxu1 }
 0x7ef   :  { %1361 = vst [vmem:[#allocation8 + $0x10] sm:$0xff] %v1355_v22 }
 0x7f0   :  { %v1357_v5 = vpop.f32.mrf.mxu1 }
 0x7f1   :  { %v1358_v8 = vadd.f32 %v2070_v32, %v1357_v5 }
 0x7f2   :  { %v1605_v11 = vpop.f32.mrf.mxu1 }
 0x7f3   :  { %1362 = vst [vmem:[#allocation8 + $0x18] sm:$0xff] %v1358_v8 }
 0x7f4   :  { %1785 = shalt.err (!%p1782_p5)
}
 0x7f5   :  { %1374 = dma.vmem_to_hbm [thread:$0]  %s1369_s10, 512, %s2132_s4, [#allocation4], %s1804_s25, %s1804_s25, %s1805_s26  }
 0x7f6   :  { %1798 = dma.done.wait [#allocation4], 512  }
 0x7f7   :  { %1799 = vsyncadd [#allocation4], 4294966784 }
 0x7f8   :  { %1378 = vsyncpa [#allocation3], 1 }
 0x7f9   :  { %1379 = vsyncpa [#allocation6], 1 }
 0x7fa   :  { %1380 = vsyncpa [#allocation4], 1 }

</bundles_post_ra>
